<compile_context>
chip_gen: v7x
topology: tpu7x:2x2x1
jax: 0.10.0
libtpu: 0.0.40
codegen_flags: <defaults>
</compile_context>

<pallas_src>
import functools

import numpy as np

import jax
import jax.numpy as jnp
from jax.experimental import pallas as pl
from jax.experimental.pallas import tpu as pltpu


# ---------------------------------------------------------------------------
# Fused forward kernel
# ---------------------------------------------------------------------------

def _vanillanet_kernel(*refs, tb, training):
    if training:
        (slab_ref, w1_ref, b1_ref, w2_ref, b2_ref, wf1_ref, fb1_ref,
         fw2_ref, fb2_ref, fw3_ref, fb3_ref,
         m1_ref, m2_ref, m3_ref, out_ref) = refs
    else:
        (slab_ref, w1_ref, b1_ref, w2_ref, b2_ref, wf1_ref, fb1_ref,
         fw2_ref, fb2_ref, fw3_ref, fb3_ref, out_ref) = refs
        m1_ref = m2_ref = m3_ref = None

    f32 = jnp.float32
    bf16 = jnp.bfloat16

    # ---- conv1 (5x5, 1->10) + 2x2 maxpool, all four pool parities in the N axis ----
    # slab rows = (pooled_row p, image b); lanes = 6 row-offsets x 28 image cols.
    s1 = slab_ref[...].astype(bf16)                                    # (12*tb, 168)
    pre1 = jnp.dot(s1, w1_ref[...], preferred_element_type=f32)        # (12*tb, 512)
    cm1 = jnp.maximum(jnp.maximum(pre1[:, 0:128], pre1[:, 128:256]),
                      jnp.maximum(pre1[:, 256:384], pre1[:, 384:512]))
    h1 = jnp.maximum(cm1 + b1_ref[...], 0.0)                           # (12*tb, 128)
    if training:
        h1 = h1 * m1_ref[...]

    # ---- conv2 (5x5, 10->20) + column-pool parity in N ------------------------------
    # Row shifts m+ki are unit-stride, 8-aligned sublane slices thanks to the
    # (row, image) ordering; pieces are 128-lane tiles so the concat is layout-free.
    slab2 = jnp.concatenate([h1[k * tb:(k + 8) * tb, :] for k in range(5)],
                            axis=1).astype(bf16)                       # (8*tb, 640)
    pre2 = jnp.dot(slab2, w2_ref[...], preferred_element_type=f32)     # (8*tb, 256)
    cm2 = jnp.maximum(pre2[:, 0:128], pre2[:, 128:256]) + b2_ref[...]  # (8*tb, 128)

    # ---- row pooling + relu + dropout + NCHW flatten folded into fc1 ----------------
    parts = [jnp.maximum(cm2[(2 * r) * tb:(2 * r + 1) * tb, :],
                         cm2[(2 * r + 1) * tb:(2 * r + 2) * tb, :]) for r in range(4)]
    h2 = jnp.maximum(jnp.concatenate(parts, axis=1), 0.0)              # (tb, 512)
    if training:
        h2 = h2 * m2_ref[...]

    z1 = jnp.dot(h2.astype(bf16), wf1_ref[...],
                 preferred_element_type=f32) + fb1_ref[...]            # (tb, 100)
    z1 = jnp.maximum(z1, 0.0)
    if training:
        z1 = z1 * m3_ref[...]

    # ---- fc2 -> tanh -> fc3 -> log_softmax (lane-dense 128-wide output) -------------
    z2 = jnp.tanh(jnp.dot(z1.astype(bf16), fw2_ref[...],
                          preferred_element_type=f32) + fb2_ref[...])
    logits = jnp.dot(z2.astype(bf16), fw3_ref[...],
                     preferred_element_type=f32) + fb3_ref[...]        # (tb, 128)
    m = jnp.max(logits, axis=-1, keepdims=True)
    lse = m + jnp.log(jnp.sum(jnp.exp(logits - m), axis=-1, keepdims=True))
    out_ref[...] = logits - lse


# ---------------------------------------------------------------------------
# Host-side constant construction (banded conv weights, parity-folded, lane padded)
# ---------------------------------------------------------------------------

def _build_consts(params, wdtype=jnp.bfloat16):
    w1 = params["conv1_w"][:, 0]                     # (10, 5, 5)   [f, ki, kj]
    w2 = params["conv2_w"]                           # (20, 10, 5, 5) [g, f, ki, kj]

    d6 = np.arange(6)
    v28 = np.arange(28)
    q12 = np.arange(12)
    n4 = np.arange(4)

    # conv1: W1cat[d*28+v, parity_block + q*10+f] = w1[f, d-ri, v-(2q+rj)]
    def band1(ri, rj):
        ki = d6 - ri                                              # (6,)
        kj = v28[:, None] - (2 * q12[None, :] + rj)               # (28, 12)
        valid = (((ki >= 0) & (ki < 5))[:, None, None]
                 & ((kj >= 0) & (kj < 5))[None, :, :])            # (6, 28, 12)
        g = w1[:, np.clip(ki, 0, 4)[:, None, None],
               np.clip(kj, 0, 4)[None, :, :]]                     # (10, 6, 28, 12)
        g = g * jnp.asarray(valid[None], dtype=g.dtype)
        m = jnp.transpose(g, (1, 2, 3, 0)).reshape(168, 120)      # [d*28+v, q*10+f]
        return jnp.pad(m, ((0, 0), (0, 8)))                       # (168, 128)

    w1cat = jnp.concatenate([band1(ri, rj) for ri in (0, 1) for rj in (0, 1)],
                            axis=1).astype(wdtype)                # (168, 512)

    # conv2: W2cat[ki*128 + q*10+f, parity_block + n*20+g] = w2[g, f, ki, q-(2n+par)]
    def band2(par):
        kj = q12[:, None] - (2 * n4[None, :] + par)               # (12, 4)
        valid = (kj >= 0) & (kj < 5)
        g = w2[:, :, :, np.clip(kj, 0, 4)]                        # (20, 10, 5, 12, 4)
        g = g * jnp.asarray(valid[None, None, None], dtype=g.dtype)
        m = jnp.transpose(g, (2, 3, 1, 4, 0)).reshape(5, 120, 80)  # [ki][q*10+f][n*20+g]
        m = jnp.pad(m, ((0, 0), (0, 8), (0, 48)))                  # (5, 128, 128)
        return m.reshape(640, 128)

    w2cat = jnp.concatenate([band2(0), band2(1)], axis=1).astype(wdtype)  # (640, 256)

    # fc1 weight reordered for the (r-lane-block, n*20+g) layout of h2; PyTorch NCHW
    # flatten index is g*16 + r*4 + n.
    wf1 = jnp.transpose(params["fc1_w"].reshape(100, 20, 4, 4), (2, 3, 1, 0))  # (r,n,g,h)
    wf1 = jnp.pad(wf1.reshape(4, 80, 100),
                  ((0, 0), (0, 48), (0, 0))).reshape(512, 100).astype(wdtype)

    b1t = jnp.pad(jnp.tile(params["conv1_b"], 12), (0, 8)).reshape(1, 128).astype(jnp.float32)
    b2t = jnp.pad(jnp.tile(params["conv2_b"], 4), (0, 48)).reshape(1, 128).astype(jnp.float32)

    fw3 = jnp.pad(params["fc3_w"].T, ((0, 0), (0, 118))).astype(wdtype)   # (F, 128)
    fb3 = jnp.concatenate([params["fc3_b"].astype(jnp.float32),
                           jnp.full((118,), -1e30, jnp.float32)]).reshape(1, 128)

    return dict(
        w1cat=w1cat, b1t=b1t,
        w2cat=w2cat, b2t=b2t,
        wf1=wf1, fb1=params["fc1_b"].reshape(1, 100).astype(jnp.float32),
        fw2=params["fc2_w"].T.astype(wdtype),
        fb2=params["fc2_b"].reshape(1, -1).astype(jnp.float32),
        fw3=fw3, fb3=fb3,
    )


# ---------------------------------------------------------------------------
# pallas_call wrapper
# ---------------------------------------------------------------------------

def _fused_forward(slab, consts, masks, *, tb, n_tiles, training):
    kernel = functools.partial(_vanillanet_kernel, tb=tb, training=training)

    def tile_spec(rows, cols):
        return pl.BlockSpec((rows, cols), lambda i: (i, 0))

    def const_spec(shape):
        return pl.BlockSpec(shape, lambda i: (0, 0))

    const_order = ["w1cat", "b1t", "w2cat", "b2t", "wf1", "fb1",
                   "fw2", "fb2", "fw3", "fb3"]
    const_args = [consts[k] for k in const_order]

    in_specs = [tile_spec(12 * tb, 168)] + [const_spec(c.shape) for c in const_args]
    args = [slab] + const_args
    if training:
        in_specs += [tile_spec(12 * tb, 128), tile_spec(tb, 512), tile_spec(tb, 100)]
        args += list(masks)

    return pl.pallas_call(
        kernel,
        grid=(n_tiles,),
        in_specs=in_specs,
        out_specs=pl.BlockSpec((tb, 128), lambda i: (i, 0)),
        out_shape=jax.ShapeDtypeStruct((n_tiles * tb, 128), jnp.float32),
        compiler_params=pltpu.CompilerParams(
            dimension_semantics=("parallel",)),
    )(*args)


# ---------------------------------------------------------------------------
# Parameters (deterministic synthetic init, PyTorch shapes)
# ---------------------------------------------------------------------------

def init_params(key, feature_dim=32):
    ks = jax.random.split(key, 10)

    def normal(k, shape, scale):
        return scale * jax.random.normal(k, shape, dtype=jnp.float32)

    return {
        "conv1_w": normal(ks[0], (10, 1, 5, 5), 0.2),    # Conv2d(1, 10, 5)
        "conv1_b": normal(ks[1], (10,), 0.1),
        "conv2_w": normal(ks[2], (20, 10, 5, 5), 0.06),  # Conv2d(10, 20, 5)
        "conv2_b": normal(ks[3], (20,), 0.1),
        "fc1_w": normal(ks[4], (100, 320), 0.05),        # Linear(320, 100)
        "fc1_b": normal(ks[5], (100,), 0.05),
        "fc2_w": normal(ks[6], (feature_dim, 100), 0.1), # Linear(100, feature_dim)
        "fc2_b": normal(ks[7], (feature_dim,), 0.05),
        "fc3_w": normal(ks[8], (10, feature_dim), 0.1),  # Linear(feature_dim, 10)
        "fc3_b": normal(ks[9], (10,), 0.05),
    }


# ---------------------------------------------------------------------------
# Forward pass (matches vanillanet.forward)
# ---------------------------------------------------------------------------

def vanillanet_forward(params, x, *, dropout_training=True, dropout_rate=0.5,
                       seed=0):
    x = x.reshape(-1, 28, 28).astype(jnp.float32)        # x.view(-1, 1, 28, 28)
    B = x.shape[0]
    # TB=32 for real batches (>=2 grid steps for B>=64 -> both v7x cores busy);
    # TB=8 keeps every block row count a multiple of 8 for tiny batches.
    tb = 32 if B >= 64 else 8
    n_tiles = -(-B // tb)
    b_pad = n_tiles * tb
    if b_pad != B:
        x = jnp.concatenate([x, jnp.zeros((b_pad - B, 28, 28), jnp.float32)], axis=0)

    # conv1 input slab (built with plain XLA; the input is tiny):
    #   slab[(tile, p, b), d*28 + v] = x[b, 2p + d, v]   for d in 0..5
    slab = jnp.concatenate([x[:, dd:dd + 24:2, :] for dd in range(6)], axis=-1)  # (b_pad,12,168)
    slab = slab.reshape(n_tiles, tb, 12, 168).transpose(0, 2, 1, 3)
    slab = slab.reshape(n_tiles * 12 * tb, 168)

    consts = _build_consts(params)

    training = bool(dropout_training)
    masks = []
    if training:
        # Host-generated inverted-dropout masks (pltpu.prng_* has no CPU/interpret
        # lowering); masks are iid so any row ordering is valid.
        keep = 1.0 - float(dropout_rate)
        k1, k2, k3 = jax.random.split(jax.random.PRNGKey(seed), 3)
        scale = jnp.float32(1.0 / keep)
        masks = [
            jax.random.bernoulli(k1, keep, (n_tiles * 12 * tb, 128)).astype(jnp.float32) * scale,
            jax.random.bernoulli(k2, keep, (n_tiles * tb, 512)).astype(jnp.float32) * scale,
            jax.random.bernoulli(k3, keep, (n_tiles * tb, 100)).astype(jnp.float32) * scale,
        ]

    out = _fused_forward(slab, consts, masks, tb=tb, n_tiles=n_tiles,
                         training=training)
    return out[:B, :10]


# ---------------------------------------------------------------------------
# Pure-JAX reference (eval mode) for a sanity check
# ---------------------------------------------------------------------------

def _reference_forward(params, x):
    x = x.reshape(-1, 1, 28, 28).astype(jnp.float32)
    dn = ("NCHW", "OIHW", "NCHW")
    y = jax.lax.conv_general_dilated(x, params["conv1_w"], (1, 1), "VALID",
                                     dimension_numbers=dn)
    y = y + params["conv1_b"][None, :, None, None]
    y = jax.lax.reduce_window(y, -jnp.inf, jax.lax.max, (1, 1, 2, 2), (1, 1, 2, 2), "VALID")
    y = jnp.maximum(y, 0.0)
    y = jax.lax.conv_general_dilated(y, params["conv2_w"], (1, 1), "VALID",
                                     dimension_numbers=dn)
    y = y + params["conv2_b"][None, :, None, None]
    y = jax.lax.reduce_window(y, -jnp.inf, jax.lax.max, (1, 1, 2, 2), (1, 1, 2, 2), "VALID")
    y = jnp.maximum(y, 0.0)
    y = y.reshape(y.shape[0], 320)
    y = jnp.maximum(y @ params["fc1_w"].T + params["fc1_b"], 0.0)
    y = jnp.tanh(y @ params["fc2_w"].T + params["fc2_b"])
    y = y @ params["fc3_w"].T + params["fc3_b"]
    return jax.nn.log_softmax(y, axis=-1)


# ---------------------------------------------------------------------------

if __name__ == "__main__":
    key = jax.random.PRNGKey(0)
    k_param, k_data = jax.random.split(key)

    feature_dim = 32
    params = init_params(k_param, feature_dim=feature_dim)

    batch = 2
    x = jax.random.normal(k_data, (batch, 784), dtype=jnp.float32)   # MNIST-like

    fwd = jax.jit(vanillanet_forward,
                  static_argnames=("dropout_training", "dropout_rate"))

    # Deterministic eval-mode run (dropout off), same as test-time forward.
    out = fwd(params, x, dropout_training=False, seed=0)
    out = jax.block_until_ready(out)
    assert out.shape == (batch, 10), out.shape
    probs_sum = jnp.sum(jnp.exp(out), axis=-1)               # log_softmax rows -> prob 1
    assert jnp.allclose(probs_sum, 1.0, atol=1e-3), probs_sum
    assert bool(jnp.all(jnp.isfinite(out)))

    # Compare against a pure-JAX f32 reference (kernel matmuls run in bf16).
    ref = _reference_forward(params, x)
    assert float(jnp.max(jnp.abs(out - ref))) < 0.1, jnp.max(jnp.abs(out - ref))

    # Training path: host-generated inverted-dropout masks applied in-kernel.
    out_train = fwd(params, x, dropout_training=True, dropout_rate=0.5, seed=7)
    out_train = jax.block_until_ready(out_train)
    assert out_train.shape == (batch, 10)
    assert bool(jnp.all(jnp.isfinite(out_train)))

    print("KERNEL_OK")
</pallas_src>

<mosaic_0001>
module attributes {stable_mosaic.version = 11 : i64} {
  func.func @_vanillanet_kernel(%arg0: i32, %arg1: memref<96x168xf32, #tpu.memory_space<vmem>>, %arg2: memref<168x512xbf16, #tpu.memory_space<vmem>>, %arg3: memref<1x128xf32, #tpu.memory_space<vmem>>, %arg4: memref<640x256xbf16, #tpu.memory_space<vmem>>, %arg5: memref<1x128xf32, #tpu.memory_space<vmem>>, %arg6: memref<512x100xbf16, #tpu.memory_space<vmem>>, %arg7: memref<1x100xf32, #tpu.memory_space<vmem>>, %arg8: memref<100x32xbf16, #tpu.memory_space<vmem>>, %arg9: memref<1x32xf32, #tpu.memory_space<vmem>>, %arg10: memref<32x128xbf16, #tpu.memory_space<vmem>>, %arg11: memref<1x128xf32, #tpu.memory_space<vmem>>, %arg12: memref<8x128xf32, #tpu.memory_space<vmem>>) attributes {dimension_semantics = [#tpu.dimension_semantics<parallel>], iteration_bounds = array<i64: 1>, scalar_prefetch = 0 : i64, scratch_operands = 0 : i64, tpu.core_type = #tpu.core_type<tc>, window_params = [{transform_indices = @transform_0, window_bounds = array<i64: 96, 168>}, {pipeline_mode = #tpu.pipeline_mode<synchronous>, transform_indices = @transform_1, window_bounds = array<i64: 168, 512>}, {pipeline_mode = #tpu.pipeline_mode<synchronous>, transform_indices = @transform_2, window_bounds = array<i64: 1, 128>}, {pipeline_mode = #tpu.pipeline_mode<synchronous>, transform_indices = @transform_3, window_bounds = array<i64: 640, 256>}, {pipeline_mode = #tpu.pipeline_mode<synchronous>, transform_indices = @transform_4, window_bounds = array<i64: 1, 128>}, {pipeline_mode = #tpu.pipeline_mode<synchronous>, transform_indices = @transform_5, window_bounds = array<i64: 512, 100>}, {pipeline_mode = #tpu.pipeline_mode<synchronous>, transform_indices = @transform_6, window_bounds = array<i64: 1, 100>}, {pipeline_mode = #tpu.pipeline_mode<synchronous>, transform_indices = @transform_7, window_bounds = array<i64: 100, 32>}, {pipeline_mode = #tpu.pipeline_mode<synchronous>, transform_indices = @transform_8, window_bounds = array<i64: 1, 32>}, {pipeline_mode = #tpu.pipeline_mode<synchronous>, transform_indices = @transform_9, window_bounds = array<i64: 32, 128>}, {pipeline_mode = #tpu.pipeline_mode<synchronous>, transform_indices = @transform_10, window_bounds = array<i64: 1, 128>}, {transform_indices = @transform_11, window_bounds = array<i64: 8, 128>}]} {
    %c0 = arith.constant 0 : index
    %c0_0 = arith.constant 0 : index
    %0 = vector.load %arg1[%c0, %c0_0] : memref<96x168xf32, #tpu.memory_space<vmem>>, vector<96x168xf32>
    %1 = arith.truncf %0 : vector<96x168xf32> to vector<96x168xbf16>
    %c0_1 = arith.constant 0 : index
    %c0_2 = arith.constant 0 : index
    %2 = vector.load %arg2[%c0_1, %c0_2] : memref<168x512xbf16, #tpu.memory_space<vmem>>, vector<168x512xbf16>
    %cst = arith.constant dense<0.000000e+00> : vector<96x512xf32>
    %3 = tpu.matmul %1, %2, %cst {dimension_numbers = #tpu.dot_dimension_numbers<[1], [0], [0], [1], [0, 0, 1, 1], [], []>} : vector<96x168xbf16>, vector<168x512xbf16>, vector<96x512xf32> -> vector<96x512xf32>
    %4 = vector.extract_strided_slice %3 {offsets = [0, 0], sizes = [96, 128], strides = [1, 1]} : vector<96x512xf32> to vector<96x128xf32>
    %5 = vector.extract_strided_slice %3 {offsets = [0, 128], sizes = [96, 128], strides = [1, 1]} : vector<96x512xf32> to vector<96x128xf32>
    %6 = arith.maximumf %4, %5 : vector<96x128xf32>
    %7 = vector.extract_strided_slice %3 {offsets = [0, 256], sizes = [96, 128], strides = [1, 1]} : vector<96x512xf32> to vector<96x128xf32>
    %8 = vector.extract_strided_slice %3 {offsets = [0, 384], sizes = [96, 128], strides = [1, 1]} : vector<96x512xf32> to vector<96x128xf32>
    %9 = arith.maximumf %7, %8 : vector<96x128xf32>
    %10 = arith.maximumf %6, %9 : vector<96x128xf32>
    %c0_3 = arith.constant 0 : index
    %c0_4 = arith.constant 0 : index
    %11 = vector.load %arg3[%c0_3, %c0_4] : memref<1x128xf32, #tpu.memory_space<vmem>>, vector<1x128xf32>
    %12 = vector.broadcast %11 : vector<1x128xf32> to vector<96x128xf32>
    %13 = arith.addf %10, %12 : vector<96x128xf32>
    %cst_5 = arith.constant 0.000000e+00 : f32
    %14 = vector.broadcast %cst_5 : f32 to vector<96x128xf32>
    %15 = arith.maximumf %13, %14 : vector<96x128xf32>
    %16 = vector.extract_strided_slice %15 {offsets = [0, 0], sizes = [64, 128], strides = [1, 1]} : vector<96x128xf32> to vector<64x128xf32>
    %17 = vector.extract_strided_slice %15 {offsets = [8, 0], sizes = [64, 128], strides = [1, 1]} : vector<96x128xf32> to vector<64x128xf32>
    %18 = vector.extract_strided_slice %15 {offsets = [16, 0], sizes = [64, 128], strides = [1, 1]} : vector<96x128xf32> to vector<64x128xf32>
    %19 = vector.extract_strided_slice %15 {offsets = [24, 0], sizes = [64, 128], strides = [1, 1]} : vector<96x128xf32> to vector<64x128xf32>
    %20 = vector.extract_strided_slice %15 {offsets = [32, 0], sizes = [64, 128], strides = [1, 1]} : vector<96x128xf32> to vector<64x128xf32>
    %21 = tpu.concatenate %16, %17, %18, %19, %20 in 1 : vector<64x128xf32>, vector<64x128xf32>, vector<64x128xf32>, vector<64x128xf32>, vector<64x128xf32> -> vector<64x640xf32>
    %22 = arith.truncf %21 : vector<64x640xf32> to vector<64x640xbf16>
    %c0_6 = arith.constant 0 : index
    %c0_7 = arith.constant 0 : index
    %23 = vector.load %arg4[%c0_6, %c0_7] : memref<640x256xbf16, #tpu.memory_space<vmem>>, vector<640x256xbf16>
    %cst_8 = arith.constant dense<0.000000e+00> : vector<64x256xf32>
    %24 = tpu.matmul %22, %23, %cst_8 {dimension_numbers = #tpu.dot_dimension_numbers<[1], [0], [0], [1], [0, 0, 1, 1], [], []>} : vector<64x640xbf16>, vector<640x256xbf16>, vector<64x256xf32> -> vector<64x256xf32>
    %25 = vector.extract_strided_slice %24 {offsets = [0, 0], sizes = [64, 128], strides = [1, 1]} : vector<64x256xf32> to vector<64x128xf32>
    %26 = vector.extract_strided_slice %24 {offsets = [0, 128], sizes = [64, 128], strides = [1, 1]} : vector<64x256xf32> to vector<64x128xf32>
    %27 = arith.maximumf %25, %26 : vector<64x128xf32>
    %c0_9 = arith.constant 0 : index
    %c0_10 = arith.constant 0 : index
    %28 = vector.load %arg5[%c0_9, %c0_10] : memref<1x128xf32, #tpu.memory_space<vmem>>, vector<1x128xf32>
    %29 = vector.broadcast %28 : vector<1x128xf32> to vector<64x128xf32>
    %30 = arith.addf %27, %29 : vector<64x128xf32>
    %31 = vector.extract_strided_slice %30 {offsets = [0, 0], sizes = [8, 128], strides = [1, 1]} : vector<64x128xf32> to vector<8x128xf32>
    %32 = vector.extract_strided_slice %30 {offsets = [8, 0], sizes = [8, 128], strides = [1, 1]} : vector<64x128xf32> to vector<8x128xf32>
    %33 = arith.maximumf %31, %32 : vector<8x128xf32>
    %34 = vector.extract_strided_slice %30 {offsets = [16, 0], sizes = [8, 128], strides = [1, 1]} : vector<64x128xf32> to vector<8x128xf32>
    %35 = vector.extract_strided_slice %30 {offsets = [24, 0], sizes = [8, 128], strides = [1, 1]} : vector<64x128xf32> to vector<8x128xf32>
    %36 = arith.maximumf %34, %35 : vector<8x128xf32>
    %37 = vector.extract_strided_slice %30 {offsets = [32, 0], sizes = [8, 128], strides = [1, 1]} : vector<64x128xf32> to vector<8x128xf32>
    %38 = vector.extract_strided_slice %30 {offsets = [40, 0], sizes = [8, 128], strides = [1, 1]} : vector<64x128xf32> to vector<8x128xf32>
    %39 = arith.maximumf %37, %38 : vector<8x128xf32>
    %40 = vector.extract_strided_slice %30 {offsets = [48, 0], sizes = [8, 128], strides = [1, 1]} : vector<64x128xf32> to vector<8x128xf32>
    %41 = vector.extract_strided_slice %30 {offsets = [56, 0], sizes = [8, 128], strides = [1, 1]} : vector<64x128xf32> to vector<8x128xf32>
    %42 = arith.maximumf %40, %41 : vector<8x128xf32>
    %43 = tpu.concatenate %33, %36, %39, %42 in 1 : vector<8x128xf32>, vector<8x128xf32>, vector<8x128xf32>, vector<8x128xf32> -> vector<8x512xf32>
    %cst_11 = arith.constant 0.000000e+00 : f32
    %44 = vector.broadcast %cst_11 : f32 to vector<8x512xf32>
    %45 = arith.maximumf %43, %44 : vector<8x512xf32>
    %46 = arith.truncf %45 : vector<8x512xf32> to vector<8x512xbf16>
    %c0_12 = arith.constant 0 : index
    %c0_13 = arith.constant 0 : index
    %47 = vector.load %arg6[%c0_12, %c0_13] : memref<512x100xbf16, #tpu.memory_space<vmem>>, vector<512x100xbf16>
    %cst_14 = arith.constant dense<0.000000e+00> : vector<8x100xf32>
    %48 = tpu.matmul %46, %47, %cst_14 {dimension_numbers = #tpu.dot_dimension_numbers<[1], [0], [0], [1], [0, 0, 1, 1], [], []>} : vector<8x512xbf16>, vector<512x100xbf16>, vector<8x100xf32> -> vector<8x100xf32>
    %c0_15 = arith.constant 0 : index
    %c0_16 = arith.constant 0 : index
    %49 = vector.load %arg7[%c0_15, %c0_16] : memref<1x100xf32, #tpu.memory_space<vmem>>, vector<1x100xf32>
    %50 = vector.broadcast %49 : vector<1x100xf32> to vector<8x100xf32>
    %51 = arith.addf %48, %50 : vector<8x100xf32>
    %cst_17 = arith.constant 0.000000e+00 : f32
    %52 = vector.broadcast %cst_17 : f32 to vector<8x100xf32>
    %53 = arith.maximumf %51, %52 : vector<8x100xf32>
    %54 = arith.truncf %53 : vector<8x100xf32> to vector<8x100xbf16>
    %c0_18 = arith.constant 0 : index
    %c0_19 = arith.constant 0 : index
    %55 = vector.load %arg8[%c0_18, %c0_19] : memref<100x32xbf16, #tpu.memory_space<vmem>>, vector<100x32xbf16>
    %cst_20 = arith.constant dense<0.000000e+00> : vector<8x32xf32>
    %56 = tpu.matmul %54, %55, %cst_20 {dimension_numbers = #tpu.dot_dimension_numbers<[1], [0], [0], [1], [0, 0, 1, 1], [], []>} : vector<8x100xbf16>, vector<100x32xbf16>, vector<8x32xf32> -> vector<8x32xf32>
    %c0_21 = arith.constant 0 : index
    %c0_22 = arith.constant 0 : index
    %57 = vector.load %arg9[%c0_21, %c0_22] : memref<1x32xf32, #tpu.memory_space<vmem>>, vector<1x32xf32>
    %58 = vector.broadcast %57 : vector<1x32xf32> to vector<8x32xf32>
    %59 = arith.addf %56, %58 : vector<8x32xf32>
    %60 = math.tanh %59 : vector<8x32xf32>
    %61 = arith.truncf %60 : vector<8x32xf32> to vector<8x32xbf16>
    %c0_23 = arith.constant 0 : index
    %c0_24 = arith.constant 0 : index
    %62 = vector.load %arg10[%c0_23, %c0_24] : memref<32x128xbf16, #tpu.memory_space<vmem>>, vector<32x128xbf16>
    %cst_25 = arith.constant dense<0.000000e+00> : vector<8x128xf32>
    %63 = tpu.matmul %61, %62, %cst_25 {dimension_numbers = #tpu.dot_dimension_numbers<[1], [0], [0], [1], [0, 0, 1, 1], [], []>} : vector<8x32xbf16>, vector<32x128xbf16>, vector<8x128xf32> -> vector<8x128xf32>
    %c0_26 = arith.constant 0 : index
    %c0_27 = arith.constant 0 : index
    %64 = vector.load %arg11[%c0_26, %c0_27] : memref<1x128xf32, #tpu.memory_space<vmem>>, vector<1x128xf32>
    %65 = vector.broadcast %64 : vector<1x128xf32> to vector<8x128xf32>
    %66 = arith.addf %63, %65 : vector<8x128xf32>
    %cst_28 = arith.constant dense<0xFF800000> : vector<8xf32>
    %67 = vector.multi_reduction <maximumf>, %66, %cst_28 [1] : vector<8x128xf32> to vector<8xf32>
    %68 = vector.shape_cast %67 : vector<8xf32> to vector<8x1xf32>
    %69 = vector.broadcast %68 : vector<8x1xf32> to vector<8x128xf32>
    %70 = arith.subf %66, %69 : vector<8x128xf32>
    %71 = math.exp %70 : vector<8x128xf32>
    %cst_29 = arith.constant dense<0.000000e+00> : vector<8xf32>
    %72 = vector.multi_reduction <add>, %71, %cst_29 [1] : vector<8x128xf32> to vector<8xf32>
    %73 = vector.shape_cast %72 : vector<8xf32> to vector<8x1xf32>
    %74 = math.log %73 : vector<8x1xf32>
    %75 = arith.addf %68, %74 : vector<8x1xf32>
    %76 = vector.broadcast %75 : vector<8x1xf32> to vector<8x128xf32>
    %77 = arith.subf %66, %76 : vector<8x128xf32>
    %c0_30 = arith.constant 0 : index
    %c0_31 = arith.constant 0 : index
    %78 = vector.load %arg12[%c0_30, %c0_31] : memref<8x128xf32, #tpu.memory_space<vmem>>, vector<8x128xf32>
    tpu.vector_store %arg12[%c0_30, %c0_31], %77 {strides = array<i32>} : memref<8x128xf32, #tpu.memory_space<vmem>>, vector<8x128xf32>,
    return
  }
  func.func @transform_0(%arg0: i32) -> (i32, i32) {
    %c0_i32 = arith.constant 0 : i32
    %c0_i32_0 = arith.constant 0 : i32
    return %arg0, %c0_i32 : i32, i32
  }
  func.func @transform_1(%arg0: i32) -> (i32, i32) {
    %c0_i32 = arith.constant 0 : i32
    %c0_i32_0 = arith.constant 0 : i32
    %c0_i32_1 = arith.constant 0 : i32
    return %c0_i32, %c0_i32_0 : i32, i32
  }
  func.func @transform_2(%arg0: i32) -> (i32, i32) {
    %c0_i32 = arith.constant 0 : i32
    %c0_i32_0 = arith.constant 0 : i32
    %c0_i32_1 = arith.constant 0 : i32
    return %c0_i32, %c0_i32_0 : i32, i32
  }
  func.func @transform_3(%arg0: i32) -> (i32, i32) {
    %c0_i32 = arith.constant 0 : i32
    %c0_i32_0 = arith.constant 0 : i32
    %c0_i32_1 = arith.constant 0 : i32
    return %c0_i32, %c0_i32_0 : i32, i32
  }
  func.func @transform_4(%arg0: i32) -> (i32, i32) {
    %c0_i32 = arith.constant 0 : i32
    %c0_i32_0 = arith.constant 0 : i32
    %c0_i32_1 = arith.constant 0 : i32
    return %c0_i32, %c0_i32_0 : i32, i32
  }
  func.func @transform_5(%arg0: i32) -> (i32, i32) {
    %c0_i32 = arith.constant 0 : i32
    %c0_i32_0 = arith.constant 0 : i32
    %c0_i32_1 = arith.constant 0 : i32
    return %c0_i32, %c0_i32_0 : i32, i32
  }
  func.func @transform_6(%arg0: i32) -> (i32, i32) {
    %c0_i32 = arith.constant 0 : i32
    %c0_i32_0 = arith.constant 0 : i32
    %c0_i32_1 = arith.constant 0 : i32
    return %c0_i32, %c0_i32_0 : i32, i32
  }
  func.func @transform_7(%arg0: i32) -> (i32, i32) {
    %c0_i32 = arith.constant 0 : i32
    %c0_i32_0 = arith.constant 0 : i32
    %c0_i32_1 = arith.constant 0 : i32
    return %c0_i32, %c0_i32_0 : i32, i32
  }
  func.func @transform_8(%arg0: i32) -> (i32, i32) {
    %c0_i32 = arith.constant 0 : i32
    %c0_i32_0 = arith.constant 0 : i32
    %c0_i32_1 = arith.constant 0 : i32
    return %c0_i32, %c0_i32_0 : i32, i32
  }
  func.func @transform_9(%arg0: i32) -> (i32, i32) {
    %c0_i32 = arith.constant 0 : i32
    %c0_i32_0 = arith.constant 0 : i32
    %c0_i32_1 = arith.constant 0 : i32
    return %c0_i32, %c0_i32_0 : i32, i32
  }
  func.func @transform_10(%arg0: i32) -> (i32, i32) {
    %c0_i32 = arith.constant 0 : i32
    %c0_i32_0 = arith.constant 0 : i32
    %c0_i32_1 = arith.constant 0 : i32
    return %c0_i32, %c0_i32_0 : i32, i32
  }
  func.func @transform_11(%arg0: i32) -> (i32, i32) {
    %c0_i32 = arith.constant 0 : i32
    %c0_i32_0 = arith.constant 0 : i32
    return %arg0, %c0_i32 : i32, i32
  }
}

</mosaic_0001>

<bundles_post_ra>
// kernel: tile.18
= control target key start
LH: loop header
LB: loop body
LE: loop exit
PB: predicated region body
PF: predicated region fallthrough
CT: control target
= control target key end

     0   :  { %s22_s0 = inlined_call_operand.vmem [shape: f32[20], index: 0, kind: input, shape index: {}]   ;;  %s23_s1 = inlined_call_operand.vmem [shape: f32[4,20], index: 1, kind: output, shape index: {}]  }
   0x1   :  { %v4_v0 = vld [vmem:[%s22_s0] ss:$0 sm:$0xff] }
   0x2   :  { %5 = vst [vmem:[%s23_s1] sm:$0xf] %v4_v0 }

// kernel: tile.19
= control target key start
LH: loop header
LB: loop body
LE: loop exit
PB: predicated region body
PF: predicated region fallthrough
CT: control target
= control target key end

     0   :  { %vm7_vm0 = vcmask 162816   ;;  %s37_s8 = smov 20   ;;  %s38_s9 = smov 40   ;;  %vm13_vm1 = vcmask 654816   ;;  %vm19_vm2 = vcmask 490816   ;;  %vm25_vm3 = vcmask 326816   ;;  %s55_s0 = inlined_call_operand.vmem [shape: f32[4,20], index: 0, kind: input, shape index: {}]   ;;  %s56_s1 = inlined_call_operand.vmem [shape: f32[80], index: 1, kind: output, shape index: {}]  }
   0x1   :  { %v4_v0 = vld [vmem:[%s55_s0] sm:$0xf]  ;;  %s36_s0 = smov 60  }
   0x2   :  { %5 = vst [vmem:[#allocation1] sm:$0xf] %v4_v0 }
   0x9   :  { %v10_v1 = vld [vmem:[#allocation1 + $0x3] sm:$0x1]   ;;  %v22_v2 = vld [vmem:[#allocation1 + $0x1] sm:$0x1]   ;;  %v6_v3 = vld [vmem:[#allocation1] sm:$0x1]  }
   0xa   :  { %11 = vrot.lane.b32.xlu0 %v10_v1, %s36_s0  ;;  %23 = vrot.lane.b32.xlu1 %v22_v2, %s37_s8  ;;  %v16_v4 = vld [vmem:[#allocation1 + $0x2] sm:$0x1]   ;;  %8 = vst.msk [vmem:[#allocation0] sm:$0x1] %vm7_vm0, %v6_v3  }
   0xe   :  { %17 = vrot.lane.b32.xlu0 %v16_v4, %s38_s9 }
  0x7c   :  { %v12_v5 = vpop.permute.xlu0 %11   ;;  %v24_v6 = vpop.permute.xlu1 %23  }
  0x7d   :  { %14 = vst.msk [vmem:[#allocation0] sm:$0x1] %vm13_vm1, %v12_v5  }
  0x80   :  { %v18_v7 = vpop.permute.xlu0 %17  }
  0x81   :  { %20 = vst.msk [vmem:[#allocation0] sm:$0x1] %vm19_vm2, %v18_v7  }
  0x82   :  { %26 = vst.msk [vmem:[#allocation0] sm:$0x1] %vm25_vm3, %v24_v6  }
  0x89   :  { %v30_v8 = vld [vmem:[#allocation0] sm:$0x1] }
  0x8a   :  { %32 = vst [vmem:[%s56_s1] sm:$0x1] %v30_v8 }

// kernel: tile.13
= control target key start
LH: loop header
LB: loop body
LE: loop exit
PB: predicated region body
PF: predicated region fallthrough
CT: control target
= control target key end

     0   :  { %s28_s0 = inlined_call_operand.vmem [shape: f32[10], index: 0, kind: input, shape index: {}]   ;;  %s29_s1 = inlined_call_operand.vmem [shape: f32[12,10], index: 1, kind: output, shape index: {}]  }
   0x1   :  { %v4_v0 = vld [vmem:[%s28_s0] ss:$0 sm:$0xff] }
   0x2   :  { %5 = vst [vmem:[%s29_s1] sm:$0xff] %v4_v0  ;;  %8 = vst [vmem:[%s29_s1 + $0x8] sm:$0xff] %v4_v0 }

// kernel: tile.14
= control target key start
LH: loop header
LB: loop body
LE: loop exit
PB: predicated region body
PF: predicated region fallthrough
CT: control target
= control target key end

     0   :  { %s99_s10 = smov 110   ;;  %s100_s11 = smov 90   ;;  %vm3_vm0 = vcmask 80896   ;;  %vm9_vm1 = vcmask 982896   ;;  %vm15_vm2 = vcmask 900896   ;;  %vm21_vm3 = vcmask 818896   ;;  %s159_s0 = inlined_call_operand.vmem [shape: f32[12,10], index: 0, kind: input, shape index: {}]   ;;  %s160_s1 = inlined_call_operand.vmem [shape: f32[120], index: 1, kind: output, shape index: {}]  }
   0x1   :  { %v77_v0 = vld [vmem:[%s159_s0 + $0xb] sm:$0x1]   ;;  %v79_v1 = vld [vmem:[%s159_s0 + $0x9] sm:$0x1]   ;;  %v78_v2 = vld [vmem:[%s159_s0 + $0xa] sm:$0x1]  }
   0x2   :  { %7 = vrot.lane.b32.xlu0 %v77_v0, %s99_s10  ;;  %19 = vrot.lane.b32.xlu1 %v79_v1, %s100_s11  ;;  %v80_v3 = vld [vmem:[%s159_s0 + $0x8] sm:$0x1]   ;;  %s101_s16 = smov 100   ;;  %s102_s17 = smov 80   ;;  %v81_v4 = vld [vmem:[%s159_s0 + $0x7] sm:$0x1]  }
   0x3   :  { %v2_v5 = vld [vmem:[%s159_s0] sm:$0x1]   ;;  %v82_v6 = vld [vmem:[%s159_s0 + $0x6] sm:$0x1]   ;;  %s103_s24 = smov 70   ;;  %s104_s25 = smov 60  }
   0x4   :  { %4 = vst.msk [vmem:[#allocation0] sm:$0x1] %vm3_vm0, %v2_v5   ;;  %v83_v7 = vld [vmem:[%s159_s0 + $0x5] sm:$0x1]   ;;  %v84_v8 = vld [vmem:[%s159_s0 + $0x4] sm:$0x1]  }
   0x5   :  { %s105_s30 = smov 50   ;;  %s106_s2 = smov 40   ;;  %v85_v9 = vld [vmem:[%s159_s0 + $0x3] sm:$0x1]   ;;  %v86_v10 = vld [vmem:[%s159_s0 + $0x2] sm:$0x1]  }
   0x6   :  { %13 = vrot.lane.b32.xlu0 %v78_v2, %s101_s16  ;;  %25 = vrot.lane.b32.xlu1 %v80_v3, %s102_s17  ;;  %s107_s7 = smov 30   ;;  %s108_s8 = smov 20   ;;  %v87_v11 = vld [vmem:[%s159_s0 + $0x1] sm:$0x1]   ;;  %vm27_vm4 = vcmask 736896   ;;  %vm33_vm5 = vcmask 654896  }
   0x7   :  { %s109_s0 = smov 10   ;;  %vm39_vm6 = vcmask 572896   ;;  %vm45_vm7 = vcmask 490896   ;;  %vm51_vm8 = vcmask 408896   ;;  %vm57_vm9 = vcmask 326896  }
   0x8   :  { %vm63_vm10 = vcmask 244896   ;;  %vm69_vm11 = vcmask 162896  }
   0xa   :  { %31 = vrot.lane.b32.xlu0 %v81_v4, %s103_s24  ;;  %37 = vrot.lane.b32.xlu1 %v82_v6, %s104_s25 }
   0xe   :  { %43 = vrot.lane.b32.xlu0 %v83_v7, %s105_s30  ;;  %49 = vrot.lane.b32.xlu1 %v84_v8, %s106_s2 }
  0x12   :  { %55 = vrot.lane.b32.xlu0 %v85_v9, %s107_s7  ;;  %61 = vrot.lane.b32.xlu1 %v86_v10, %s108_s8 }
  0x16   :  { %67 = vrot.lane.b32.xlu0 %v87_v11, %s109_s0 }
  0x74   :  { %v8_v12 = vpop.permute.xlu0 %7   ;;  %v20_v13 = vpop.permute.xlu1 %19  }
  0x75   :  { %10 = vst.msk [vmem:[#allocation0] sm:$0x1] %vm9_vm1, %v8_v12  }
  0x78   :  { %v14_v14 = vpop.permute.xlu0 %13   ;;  %v26_v15 = vpop.permute.xlu1 %25  }
  0x79   :  { %16 = vst.msk [vmem:[#allocation0] sm:$0x1] %vm15_vm2, %v14_v14  }
  0x7a   :  { %22 = vst.msk [vmem:[#allocation0] sm:$0x1] %vm21_vm3, %v20_v13  }
  0x7b   :  { %28 = vst.msk [vmem:[#allocation0] sm:$0x1] %vm27_vm4, %v26_v15  }
  0x7c   :  { %v32_v16 = vpop.permute.xlu0 %31   ;;  %v38_v17 = vpop.permute.xlu1 %37  }
  0x7d   :  { %34 = vst.msk [vmem:[#allocation0] sm:$0x1] %vm33_vm5, %v32_v16  }
  0x7e   :  { %40 = vst.msk [vmem:[#allocation0] sm:$0x1] %vm39_vm6, %v38_v17  }
  0x80   :  { %v44_v18 = vpop.permute.xlu0 %43   ;;  %v50_v19 = vpop.permute.xlu1 %49  }
  0x81   :  { %46 = vst.msk [vmem:[#allocation0] sm:$0x1] %vm45_vm7, %v44_v18  }
  0x82   :  { %52 = vst.msk [vmem:[#allocation0] sm:$0x1] %vm51_vm8, %v50_v19  }
  0x84   :  { %v56_v20 = vpop.permute.xlu0 %55   ;;  %v62_v21 = vpop.permute.xlu1 %61  }
  0x85   :  { %58 = vst.msk [vmem:[#allocation0] sm:$0x1] %vm57_vm9, %v56_v20  }
  0x86   :  { %64 = vst.msk [vmem:[#allocation0] sm:$0x1] %vm63_vm10, %v62_v21  }
  0x88   :  { %v68_v22 = vpop.permute.xlu0 %67  }
  0x89   :  { %70 = vst.msk [vmem:[#allocation0] sm:$0x1] %vm69_vm11, %v68_v22  }
  0x90   :  { %v74_v23 = vld [vmem:[#allocation0] sm:$0x1] }
  0x91   :  { %76 = vst [vmem:[%s160_s1] sm:$0x1] %v74_v23 }

// kernel: vanillanet_forward.1
= control target key start
LH: loop header
LB: loop body
LE: loop exit
PB: predicated region body
PF: predicated region fallthrough
CT: control target
= control target key end

     0   :  { %vm327_vm0 = vcmask 326656   ;;  %vm346_vm1 = vcmask 1043456   ;;  %vm1765_vm2 = vcmask 1041408   ;;  %vm2429_vm3 = vmmov 0   ;;  %s3127_s1 = inlined_call_operand.vmem [shape: bf16[168,512], index: 1, kind: input, shape index: {}]   ;;  %s3128_s0 = inlined_call_operand.vmem [shape: f32[96,168], index: 0, kind: input, shape index: {}]   ;;  %s3129_s3 = inlined_call_operand.vmem [shape: bf16[640,256], index: 3, kind: input, shape index: {}]   ;;  %s3130_s2 = inlined_call_operand.vmem [shape: f32[1,128], index: 2, kind: input, shape index: {}]   ;;  %s3131_s5 = inlined_call_operand.vmem [shape: bf16[512,100], index: 5, kind: input, shape index: {}]   ;;  %s3132_s4 = inlined_call_operand.vmem [shape: f32[1,128], index: 4, kind: input, shape index: {}]   ;;  %s3133_s7 = inlined_call_operand.vmem [shape: bf16[100,32], index: 7, kind: input, shape index: {}]   ;;  %s3134_s6 = inlined_call_operand.vmem [shape: f32[1,100], index: 6, kind: input, shape index: {}]   ;;  %s3135_s9 = inlined_call_operand.vmem [shape: bf16[32,128], index: 9, kind: input, shape index: {}]   ;;  %s3136_s8 = inlined_call_operand.vmem [shape: f32[1,32], index: 8, kind: input, shape index: {}]   ;;  %s3137_s10 = inlined_call_operand.vmem [shape: f32[1,128], index: 10, kind: input, shape index: {}]   ;;  %s3138_s11 = inlined_call_operand.vmem [shape: f32[8,128], index: 11, kind: output, shape index: {}]  }
   0x1   :  { %v2196_v0 = vld [vmem:[%s3127_s1 + $0x4] ss:$16 sps:$4 sm:$0xff]   ;;  %v2198_v1 = vld [vmem:[%s3127_s1 + $0xc] ss:$16 sps:$4 sm:$0xff]   ;;  %v2200_v2 = vld [vmem:[%s3127_s1] ss:$16 sps:$4 sm:$0xff]  }
   0x2   :  { %359 = vmatprep.subr.bf16.mxu0 %v2196_v0  ;;  %v2201_v3 = vld [vmem:[%s3127_s1 + $0x8] ss:$16 sps:$4 sm:$0xff]   ;;  %452 = vmatprep.subr.bf16.mxu1 %v2198_v1  ;;  %v2202_v4 = vld [vmem:[%s3127_s1 + $0x24] ss:$16 sps:$4 sm:$0xff]   ;;  %v2204_v5 = vld [vmem:[%s3127_s1 + $0x2c] ss:$16 sps:$4 sm:$0xff]  }
   0x3   :  { %360 = vmatpush1.bf16.msra.mxu0 %v2200_v2  ;;  %453 = vmatpush1.bf16.msra.mxu1 %v2201_v3  ;;  %v2206_v6 = vld [vmem:[%s3127_s1 + $0x20] ss:$16 sps:$4 sm:$0xff]   ;;  %v2207_v7 = vld [vmem:[%s3127_s1 + $0x28] ss:$16 sps:$4 sm:$0xff]   ;;  %v2208_v8 = vld [vmem:[%s3127_s1 + $0x44] ss:$16 sps:$4 sm:$0xff]  }
   0x4   :  { %361 = vmatprep.subr.bf16.mxu0 %v2202_v4  ;;  %454 = vmatprep.subr.bf16.mxu1 %v2204_v5  ;;  %v2210_v9 = vld [vmem:[%s3127_s1 + $0x4c] ss:$16 sps:$4 sm:$0xff]   ;;  %v2212_v10 = vld [vmem:[%s3127_s1 + $0x40] ss:$16 sps:$4 sm:$0xff]   ;;  %v2213_v11 = vld [vmem:[%s3127_s1 + $0x48] ss:$16 sps:$4 sm:$0xff]  }
   0x5   :  { %v2214_v12 = vld [vmem:[%s3127_s1 + $0x64] ss:$16 sps:$4 sm:$0xff]   ;;  %v2216_v13 = vld [vmem:[%s3127_s1 + $0x6c] ss:$16 sps:$4 sm:$0xff]   ;;  %v2218_v14 = vld [vmem:[%s3127_s1 + $0x60] ss:$16 sps:$4 sm:$0xff]  }
   0x6   :  { %v2219_v15 = vld [vmem:[%s3127_s1 + $0x68] ss:$16 sps:$4 sm:$0xff]   ;;  %v2220_v16 = vld [vmem:[%s3127_s1 + $0x84] ss:$16 sps:$4 sm:$0xff]   ;;  %v2222_v17 = vld [vmem:[%s3127_s1 + $0x8c] ss:$16 sps:$4 sm:$0xff]  }
   0x7   :  { %362 = vmatpush1.bf16.msra.mxu0 %v2206_v6  ;;  %455 = vmatpush1.bf16.msra.mxu1 %v2207_v7  ;;  %v2224_v18 = vld [vmem:[%s3127_s1 + $0x80] ss:$16 sps:$4 sm:$0xff]   ;;  %v2225_v19 = vld [vmem:[%s3127_s1 + $0x88] ss:$16 sps:$4 sm:$0xff]   ;;  %v2226_v20 = vld [vmem:[%s3127_s1 + $0xa4] ss:$16 sps:$4 sm:$0xff]  }
   0x8   :  { %363 = vmatprep.subr.bf16.mxu0 %v2208_v8  ;;  %456 = vmatprep.subr.bf16.mxu1 %v2210_v9  ;;  %v2228_v21 = vld [vmem:[%s3127_s1 + $0xac] ss:$16 sps:$4 sm:$0xff]   ;;  %v2230_v22 = vld [vmem:[%s3127_s1 + $0xa0] ss:$16 sps:$4 sm:$0xff]   ;;  %v2231_v23 = vld [vmem:[%s3127_s1 + $0xa8] ss:$16 sps:$4 sm:$0xff]  }
   0x9   :  { %v2232_v24 = vld [vmem:[%s3127_s1 + $0xc4] ss:$16 sps:$4 sm:$0xff]   ;;  %v2234_v25 = vld [vmem:[%s3127_s1 + $0xcc] ss:$16 sps:$4 sm:$0xff]   ;;  %v2236_v26 = vld [vmem:[%s3127_s1 + $0xc0] ss:$16 sps:$4 sm:$0xff]  }
   0xa   :  { %v2237_v27 = vld [vmem:[%s3127_s1 + $0xc8] ss:$16 sps:$4 sm:$0xff]   ;;  %v2238_v28 = vld [vmem:[%s3127_s1 + $0xe4] ss:$16 sps:$4 sm:$0xff]   ;;  %v2240_v29 = vld [vmem:[%s3127_s1 + $0xec] ss:$16 sps:$4 sm:$0xff]  }
   0xb   :  { %364 = vmatpush1.bf16.msra.mxu0 %v2212_v10  ;;  %457 = vmatpush1.bf16.msra.mxu1 %v2213_v11  ;;  %v40_v30 = vld [vmem:[%s3128_s0 + $0x8] sm:$0xff]  ;;  %v42_v31 = vld [vmem:[%s3128_s0 + $0x18] sm:$0xff]  ;;  %v2242_v32 = vld [vmem:[%s3127_s1 + $0xe0] ss:$16 sps:$4 sm:$0xff]   ;;  %vm1761_vm4 = vcmask 818176   ;;  %vm1834_vm5 = vcmask 261120  }
   0xc   :  { %365 = vmatprep.subr.bf16.mxu0 %v2214_v12  ;;  %458 = vmatprep.subr.bf16.mxu1 %v2216_v13  ;;  %v2243_v33 = vld [vmem:[%s3127_s1 + $0xe8] ss:$16 sps:$4 sm:$0xff]   ;;  %v64_v34 = vpack.c.bf16 %v42_v31, %v40_v30  ;;  %v2244_v35 = vld [vmem:[%s3127_s1 + $0x104] ss:$16 sps:$4 sm:$0xff]   ;;  %v2246_v36 = vld [vmem:[%s3127_s1 + $0x10c] ss:$16 sps:$4 sm:$0xff]  }
   0xd   :  { %v2248_v37 = vld [vmem:[%s3127_s1 + $0x100] ss:$16 sps:$4 sm:$0xff]   ;;  %v2249_v38 = vld [vmem:[%s3127_s1 + $0x108] ss:$16 sps:$4 sm:$0xff]   ;;  %v2250_v39 = vld [vmem:[%s3127_s1 + $0x124] ss:$16 sps:$4 sm:$0xff]  }
   0xe   :  { %1939 = vmatprep.mubr.msk.bf16.mxu0 %vm327_vm0, %v64_v34  ;;  %1946 = vmatprep.mubr.msk.bf16.mxu1 %vm327_vm0, %v64_v34  ;;  %v2252_v40 = vld [vmem:[%s3127_s1 + $0x12c] ss:$16 sps:$4 sm:$0xff]   ;;  %v115_v41 = vld [vmem:[%s3127_s1 + $0x140] sm:$0xff]  ;;  %v2255_v44 = vld [vmem:[%s3127_s1 + $0x128] ss:$16 sps:$4 sm:$0xff]  }
   0xf   :  { %366 = vmatpush1.bf16.msra.mxu0 %v2218_v14  ;;  %459 = vmatpush1.bf16.msra.mxu1 %v2219_v15  ;;  %v116_v42 = vld [vmem:[%s3127_s1 + $0x148] sm:$0xff]  ;;  %v2254_v43 = vld [vmem:[%s3127_s1 + $0x120] ss:$16 sps:$4 sm:$0xff]   ;;  %v1935_v45 = vcombine.high %v115_v41, %v115_v41  ;;  %v1934_v47 = vcombine.low %v115_v41, %v115_v41  ;;  %v46_v54 = vld [vmem:[%s3128_s0 + $0x38] sm:$0xff] }
  0x10   :  { %367 = vmatprep.subr.bf16.mxu0 %v2220_v16  ;;  %460 = vmatprep.subr.bf16.mxu1 %v2222_v17  ;;  %v1937_v46 = vcombine.high %v116_v42, %v116_v42  ;;  %v1936_v48 = vcombine.low %v116_v42, %v116_v42  ;;  %v39_v49 = vld [vmem:[%s3128_s0] sm:$0xff]  ;;  %v41_v50 = vld [vmem:[%s3128_s0 + $0x10] sm:$0xff]  ;;  %v44_v51 = vld [vmem:[%s3128_s0 + $0x28] sm:$0xff] }
  0x11   :  { %v348_v52 = vsel %vm346_vm1, %v1934_v47, 0  ;;  %v2262_v55 = vld [vmem:[%s3129_s3 + $0x4] ss:$8 sps:$4 sm:$0xff]   ;;  %v63_v56 = vpack.c.bf16 %v41_v50, %v39_v49  ;;  %v66_v57 = vpack.c.bf16 %v46_v54, %v44_v51  ;;  %v2260_v58 = vld [vmem:[%s3129_s3] ss:$8 sps:$4 sm:$0xff]   ;;  %v45_v61 = vld [vmem:[%s3128_s0 + $0x30] sm:$0xff] }
  0x12   :  { %v354_v53 = vsel %vm346_vm1, %v1936_v48, 0  ;;  %v43_v59 = vld [vmem:[%s3128_s0 + $0x20] sm:$0xff]  ;;  %v2265_v60 = vld [vmem:[%s3129_s3 + $0x14] ss:$8 sps:$4 sm:$0xff]   ;;  %v48_v62 = vld [vmem:[%s3128_s0 + $0x48] sm:$0xff] }
  0x13   :  { %368 = vmatpush1.bf16.msra.mxu0 %v2224_v18  ;;  %461 = vmatpush1.bf16.msra.mxu1 %v2225_v19  ;;  %v50_v63 = vld [vmem:[%s3128_s0 + $0x58] sm:$0xff]  ;;  %v2268_v1 = vld [vmem:[%s3129_s3 + $0x24] ss:$8 sps:$4 sm:$0xff]   ;;  %v65_v2 = vpack.c.bf16 %v45_v61, %v43_v59  ;;  %v2266_v3 = vld [vmem:[%s3129_s3 + $0x20] ss:$8 sps:$4 sm:$0xff]  }
  0x14   :  { %369 = vmatprep.subr.bf16.mxu0 %v2226_v20  ;;  %462 = vmatprep.subr.bf16.mxu1 %v2228_v21  ;;  %v2263_v0 = vld [vmem:[%s3129_s3 + $0x10] ss:$8 sps:$4 sm:$0xff]   ;;  %v68_v4 = vpack.c.bf16 %v50_v63, %v48_v62  ;;  %v2271_v5 = vld [vmem:[%s3129_s3 + $0x34] ss:$8 sps:$4 sm:$0xff]   ;;  %v47_v6 = vld [vmem:[%s3128_s0 + $0x40] sm:$0xff] }
  0x15   :  { %v49_v7 = vld [vmem:[%s3128_s0 + $0x50] sm:$0xff]  ;;  %v52_v8 = vld [vmem:[%s3128_s0 + $0x68] sm:$0xff]  ;;  %v54_v9 = vld [vmem:[%s3128_s0 + $0x78] sm:$0xff] }
  0x16   :  { %v2269_v10 = vld [vmem:[%s3129_s3 + $0x30] ss:$8 sps:$4 sm:$0xff]   ;;  %v2274_v11 = vld [vmem:[%s3129_s3 + $0x44] ss:$8 sps:$4 sm:$0xff]   ;;  %v67_v12 = vpack.c.bf16 %v49_v7, %v47_v6  ;;  %v2272_v13 = vld [vmem:[%s3129_s3 + $0x40] ss:$8 sps:$4 sm:$0xff]   ;;  %v70_v14 = vpack.c.bf16 %v54_v9, %v52_v8 }
  0x17   :  { %370 = vmatpush1.bf16.msra.mxu0 %v2230_v22  ;;  %463 = vmatpush1.bf16.msra.mxu1 %v2231_v23  ;;  %v2277_v15 = vld [vmem:[%s3129_s3 + $0x54] ss:$8 sps:$4 sm:$0xff]   ;;  %v51_v16 = vld [vmem:[%s3128_s0 + $0x60] sm:$0xff]  ;;  %v56_v18 = vld [vmem:[%s3128_s0 + $0x88] sm:$0xff] }
  0x18   :  { %371 = vmatprep.subr.bf16.mxu0 %v2232_v24  ;;  %464 = vmatprep.subr.bf16.mxu1 %v2234_v25  ;;  %v53_v17 = vld [vmem:[%s3128_s0 + $0x70] sm:$0xff]  ;;  %v58_v19 = vld [vmem:[%s3128_s0 + $0x98] sm:$0xff]  ;;  %v2280_v21 = vld [vmem:[%s3129_s3 + $0x64] ss:$8 sps:$4 sm:$0xff]  }
  0x19   :  { %v2275_v20 = vld [vmem:[%s3129_s3 + $0x50] ss:$8 sps:$4 sm:$0xff]   ;;  %v69_v22 = vpack.c.bf16 %v53_v17, %v51_v16  ;;  %v72_v23 = vpack.c.bf16 %v58_v19, %v56_v18  ;;  %v2278_v24 = vld [vmem:[%s3129_s3 + $0x60] ss:$8 sps:$4 sm:$0xff]   ;;  %v2283_v25 = vld [vmem:[%s3129_s3 + $0x74] ss:$8 sps:$4 sm:$0xff]  }
  0x1a   :  { %v2281_v30 = vld [vmem:[%s3129_s3 + $0x70] ss:$8 sps:$4 sm:$0xff]   ;;  %v2286_v31 = vld [vmem:[%s3129_s3 + $0x84] ss:$8 sps:$4 sm:$0xff]   ;;  %v2284_v34 = vld [vmem:[%s3129_s3 + $0x80] ss:$8 sps:$4 sm:$0xff]  }
  0x1b   :  { %372 = vmatpush1.bf16.msra.mxu0 %v2236_v26  ;;  %465 = vmatpush1.bf16.msra.mxu1 %v2237_v27  ;;  %v55_v26 = vld [vmem:[%s3128_s0 + $0x80] sm:$0xff]  ;;  %v57_v27 = vld [vmem:[%s3128_s0 + $0x90] sm:$0xff] }
  0x1c   :  { %373 = vmatprep.subr.bf16.mxu0 %v2238_v28  ;;  %466 = vmatprep.subr.bf16.mxu1 %v2240_v29  ;;  %v60_v28 = vld [vmem:[%s3128_s0 + $0xa8] sm:$0xff]  ;;  %v62_v29 = vld [vmem:[%s3128_s0 + $0xb8] sm:$0xff] }
  0x1d   :  { %v2290_v41 = vld [vmem:[%s3129_s3 + $0xa0] ss:$8 sps:$4 sm:$0xff]   ;;  %v2295_v42 = vld [vmem:[%s3129_s3 + $0xb4] ss:$8 sps:$4 sm:$0xff]   ;;  %v2299_v47 = vld [vmem:[%s3129_s3 + $0xd0] ss:$8 sps:$4 sm:$0xff]  }
  0x1e   :  { %v2304_v48 = vld [vmem:[%s3129_s3 + $0xe4] ss:$8 sps:$4 sm:$0xff]   ;;  %v2302_v49 = vld [vmem:[%s3129_s3 + $0xe0] ss:$8 sps:$4 sm:$0xff]   ;;  %v2307_v50 = vld [vmem:[%s3129_s3 + $0xf4] ss:$8 sps:$4 sm:$0xff]  }
  0x1f   :  { %374 = vmatpush1.bf16.msra.mxu0 %v2242_v32  ;;  %467 = vmatpush1.bf16.msra.mxu1 %v2243_v33  ;;  %v71_v32 = vpack.c.bf16 %v57_v27, %v55_v26  ;;  %v74_v33 = vpack.c.bf16 %v62_v29, %v60_v28  ;;  %v2305_v51 = vld [vmem:[%s3129_s3 + $0xf0] ss:$8 sps:$4 sm:$0xff]   ;;  %v2311_v54 = vld [vmem:[%s3129_s3 + $0x200] ss:$8 sps:$4 sm:$0xff]   ;;  %v2331_v59 = vld [vmem:[%s3129_s3 + $0x234] ss:$8 sps:$4 sm:$0xff]  }
  0x20   :  { %375 = vmatprep.subr.bf16.mxu0 %v2244_v35  ;;  %468 = vmatprep.subr.bf16.mxu1 %v2246_v36  ;;  %v2289_v35 = vld [vmem:[%s3129_s3 + $0x94] ss:$8 sps:$4 sm:$0xff]   ;;  %v59_v36 = vld [vmem:[%s3128_s0 + $0xa0] sm:$0xff]  ;;  %v2341_v63 = vld [vmem:[%s3129_s3 + $0x250] ss:$8 sps:$4 sm:$0xff]  }
  0x21   :  { %v2337_v61 = vld [vmem:[%s3129_s3 + $0x244] ss:$8 sps:$4 sm:$0xff]   ;;  %v2335_v62 = vld [vmem:[%s3129_s3 + $0x240] ss:$8 sps:$4 sm:$0xff]  }
  0x23   :  { %376 = vmatpush1.bf16.msra.mxu0 %v2248_v37  ;;  %469 = vmatpush1.bf16.msra.mxu1 %v2249_v38  ;;  %v61_v37 = vld [vmem:[%s3128_s0 + $0xb0] sm:$0xff] }
  0x24   :  { %377 = vmatprep.subr.bf16.mxu0 %v2250_v39  ;;  %470 = vmatprep.subr.bf16.mxu1 %v2252_v40  ;;  %v2287_v38 = vld [vmem:[%s3129_s3 + $0x90] ss:$8 sps:$4 sm:$0xff]   ;;  %v2292_v39 = vld [vmem:[%s3129_s3 + $0xa4] ss:$8 sps:$4 sm:$0xff]   ;;  %v73_v40 = vpack.c.bf16 %v61_v37, %v59_v36 }
  0x27   :  { %378 = vmatpush1.bf16.msra.mxu0 %v2254_v43  ;;  %471 = vmatpush1.bf16.msra.mxu1 %v2255_v44  ;;  %v2293_v43 = vld [vmem:[%s3129_s3 + $0xb0] ss:$8 sps:$4 sm:$0xff]   ;;  %v2298_v44 = vld [vmem:[%s3129_s3 + $0xc4] ss:$8 sps:$4 sm:$0xff]  }
  0x28   :  { %1938 = vmatprep.subr.msk.bf16.mxu0 %vm346_vm1, %v1935_v45  ;;  %1945 = vmatprep.subr.msk.bf16.mxu1 %vm346_vm1, %v1937_v46  ;;  %v2296_v45 = vld [vmem:[%s3129_s3 + $0xc0] ss:$8 sps:$4 sm:$0xff]   ;;  %v2301_v46 = vld [vmem:[%s3129_s3 + $0xd4] ss:$8 sps:$4 sm:$0xff]  }
  0x2b   :  { %380 = vmatpush1.bf16.msra.mxu0 %v348_v52  ;;  %473 = vmatpush1.bf16.msra.mxu1 %v354_v53  ;;  %v2310_v52 = vld [vmem:[%s3129_s3 + $0x104] ss:$8 sps:$4 sm:$0xff]  }
  0x2c   :  { %1103 = vmatprep.subr.bf16.mxu0 %v2262_v55  ;;  %v2313_v53 = vld [vmem:[%s3129_s3 + $0x204] ss:$8 sps:$4 sm:$0xff]   ;;  %v2319_v55 = vld [vmem:[%s3129_s3 + $0x214] ss:$8 sps:$4 sm:$0xff]  }
  0x2d   :  { %1249 = vmatprep.subr.bf16.mxu1 %v2313_v53 }
  0x2e   :  { %392 = vmatmul.mubr.bf16.vlgmr.msra.gmra.mrb[0].mxu0 %v63_v56  ;;  %485 = vmatmul.mubr.bf16.vlgmr.msra.gmra.mrb[0].mxu1 %v63_v56  ;;  %v2317_v56 = vld [vmem:[%s3129_s3 + $0x210] ss:$8 sps:$4 sm:$0xff]  }
  0x2f   :  { %1940 = vmatprep.mubr.msk.bf16.mxu0 %vm327_vm0, %v66_v57  ;;  %1947 = vmatprep.mubr.msk.bf16.mxu1 %vm327_vm0, %v66_v57  ;;  %v2325_v57 = vld [vmem:[%s3129_s3 + $0x224] ss:$8 sps:$4 sm:$0xff]  }
  0x30   :  { %1104 = vmatpush1.bf16.msra.mxu0 %v2260_v58  ;;  %1250 = vmatpush1.bf16.msra.mxu1 %v2311_v54  ;;  %v2323_v58 = vld [vmem:[%s3129_s3 + $0x220] ss:$8 sps:$4 sm:$0xff]  }
  0x31   :  { %1105 = vmatprep.subr.bf16.mxu0 %v2265_v60  ;;  %1251 = vmatprep.subr.bf16.mxu1 %v2319_v55  ;;  %v2329_v60 = vld [vmem:[%s3129_s3 + $0x230] ss:$8 sps:$4 sm:$0xff]  }
  0x34   :  { %1106 = vmatpush1.bf16.msra.mxu0 %v2263_v0  ;;  %1252 = vmatpush1.bf16.msra.mxu1 %v2317_v56  ;;  %v2343_v0 = vld [vmem:[%s3129_s3 + $0x254] ss:$8 sps:$4 sm:$0xff]  }
  0x35   :  { %1107 = vmatprep.subr.bf16.mxu0 %v2268_v1  ;;  %1253 = vmatprep.subr.bf16.mxu1 %v2325_v57  ;;  %v2347_v1 = vld [vmem:[%s3129_s3 + $0x260] ss:$8 sps:$4 sm:$0xff]   ;;  %v2316_v56 = vld [vmem:[%s3129_s3 + $0x114] ss:$8 sps:$4 sm:$0xff]  }
  0x36   :  { %402 = vmatmul.mubr.bf16.gmra.mrb[4].mxu0 %v65_v2  ;;  %495 = vmatmul.mubr.bf16.gmra.mrb[4].mxu1 %v65_v2  ;;  %v2349_v2 = vld [vmem:[%s3129_s3 + $0x264] ss:$8 sps:$4 sm:$0xff]  }
  0x37   :  { %1941 = vmatprep.mubr.msk.bf16.mxu0 %vm327_vm0, %v68_v4  ;;  %1948 = vmatprep.mubr.msk.bf16.mxu1 %vm327_vm0, %v68_v4  ;;  %v2355_v4 = vld [vmem:[%s3129_s3 + $0x274] ss:$8 sps:$4 sm:$0xff]  }
  0x38   :  { %1108 = vmatpush1.bf16.msra.mxu0 %v2266_v3  ;;  %1254 = vmatpush1.bf16.msra.mxu1 %v2323_v58  ;;  %v2353_v3 = vld [vmem:[%s3129_s3 + $0x270] ss:$8 sps:$4 sm:$0xff]  }
  0x39   :  { %1109 = vmatprep.subr.bf16.mxu0 %v2271_v5  ;;  %1255 = vmatprep.subr.bf16.mxu1 %v2331_v59  ;;  %v2427_v5 = vmov 0  }
  0x3c   :  { %1110 = vmatpush1.bf16.msra.mxu0 %v2269_v10  ;;  %1256 = vmatpush1.bf16.msra.mxu1 %v2329_v60 }
  0x3d   :  { %1111 = vmatprep.subr.bf16.mxu0 %v2274_v11  ;;  %1257 = vmatprep.subr.bf16.mxu1 %v2337_v61 }
  0x3e   :  { %412 = vmatmul.mubr.bf16.gmra.mrb[8].mxu0 %v67_v12  ;;  %505 = vmatmul.mubr.bf16.gmra.mrb[8].mxu1 %v67_v12 }
  0x3f   :  { %1942 = vmatprep.mubr.msk.bf16.mxu0 %vm327_vm0, %v70_v14  ;;  %1949 = vmatprep.mubr.msk.bf16.mxu1 %vm327_vm0, %v70_v14  ;;  %v2851_v14 = vld [vmem:[%s3130_s2] ss:$0 sm:$0xff] }
  0x40   :  { %1112 = vmatpush1.bf16.msra.mxu0 %v2272_v13  ;;  %1258 = vmatpush1.bf16.msra.mxu1 %v2335_v62 }
  0x41   :  { %1113 = vmatprep.subr.bf16.mxu0 %v2277_v15  ;;  %1259 = vmatprep.subr.bf16.mxu1 %v2343_v0  ;;  %v2322_v0 = vld [vmem:[%s3129_s3 + $0x124] ss:$8 sps:$4 sm:$0xff]  }
  0x44   :  { %1114 = vmatpush1.bf16.msra.mxu0 %v2275_v20  ;;  %1260 = vmatpush1.bf16.msra.mxu1 %v2341_v63  ;;  %v2314_v63 = vld [vmem:[%s3129_s3 + $0x110] ss:$8 sps:$4 sm:$0xff]  }
  0x45   :  { %1115 = vmatprep.subr.bf16.mxu0 %v2280_v21  ;;  %1261 = vmatprep.subr.bf16.mxu1 %v2349_v2 }
  0x46   :  { %422 = vmatmul.mubr.bf16.gmra.mrb[12].mxu0 %v69_v22  ;;  %515 = vmatmul.mubr.bf16.gmra.mrb[12].mxu1 %v69_v22 }
  0x47   :  { %1943 = vmatprep.mubr.msk.bf16.mxu0 %vm327_vm0, %v72_v23  ;;  %1950 = vmatprep.mubr.msk.bf16.mxu1 %vm327_vm0, %v72_v23 }
  0x48   :  { %1116 = vmatpush1.bf16.msra.mxu0 %v2278_v24  ;;  %1262 = vmatpush1.bf16.msra.mxu1 %v2347_v1 }
  0x49   :  { %1117 = vmatprep.subr.bf16.mxu0 %v2283_v25  ;;  %1263 = vmatprep.subr.bf16.mxu1 %v2355_v4 }
  0x4c   :  { %1118 = vmatpush1.bf16.msra.mxu0 %v2281_v30  ;;  %1264 = vmatpush1.bf16.msra.mxu1 %v2353_v3 }
  0x4d   :  { %1119 = vmatprep.subr.bf16.mxu0 %v2286_v31 }
  0x4e   :  { %432 = vmatmul.mubr.bf16.gmra.mrb[16].mxu0 %v71_v32  ;;  %525 = vmatmul.mubr.bf16.gmra.mrb[16].mxu1 %v71_v32 }
  0x4f   :  { %1944 = vmatprep.mubr.msk.bf16.mxu0 %vm327_vm0, %v74_v33  ;;  %1951 = vmatprep.mubr.msk.bf16.mxu1 %vm327_vm0, %v74_v33 }
  0x50   :  { %1120 = vmatpush1.bf16.msra.mxu0 %v2284_v34 }
  0x51   :  { %1121 = vmatprep.subr.bf16.mxu0 %v2289_v35 }
  0x54   :  { %1122 = vmatpush1.bf16.msra.mxu0 %v2287_v38 }
  0x55   :  { %1123 = vmatprep.subr.bf16.mxu0 %v2292_v39 }
  0x56   :  { %442 = vmatmul.mubr.bf16.gmra.mrb[20].mxu0 %v73_v40  ;;  %535 = vmatmul.mubr.bf16.gmra.mrb[20].mxu1 %v73_v40 }
  0x57   :  { %1281 = vmatprep.mubr.bf16.mxu1 %v2427_v5 }
  0x58   :  { %1124 = vmatpush1.bf16.msra.mxu0 %v2290_v41 }
  0x59   :  { %1125 = vmatprep.subr.bf16.mxu0 %v2295_v42 }
  0x5c   :  { %1126 = vmatpush1.bf16.msra.mxu0 %v2293_v43 }
  0x5d   :  { %1127 = vmatprep.subr.bf16.mxu0 %v2298_v44 }
  0x60   :  { %1128 = vmatpush1.bf16.msra.mxu0 %v2296_v45 }
  0x61   :  { %1129 = vmatprep.subr.bf16.mxu0 %v2301_v46 }
  0x64   :  { %1130 = vmatpush1.bf16.msra.mxu0 %v2299_v47 }
  0x65   :  { %1131 = vmatprep.subr.bf16.mxu0 %v2304_v48 }
  0x68   :  { %1132 = vmatpush1.bf16.msra.mxu0 %v2302_v49 }
  0x69   :  { %1133 = vmatprep.subr.bf16.mxu0 %v2307_v50 }
  0x6c   :  { %1134 = vmatpush1.bf16.msra.mxu0 %v2305_v51  ;;  %v2308_v51 = vld [vmem:[%s3129_s3 + $0x100] ss:$8 sps:$4 sm:$0xff]  }
  0x6d   :  { %1176 = vmatprep.subr.bf16.mxu0 %v2310_v52 }
 0x101   :  { %v393_v6 = vpop.f32.mrb[0].mxu0  ;;  %v486_v7 = vpop.f32.mrb[0].mxu1 }
 0x102   :  { %v395_v8 = vpop.f32.mrb[1].mxu0  ;;  %v488_v9 = vpop.f32.mrb[1].mxu1 }
 0x103   :  { %v545_v10 = vmax.f32 %v393_v6, %v395_v8  ;;  %v557_v11 = vmax.f32 %v486_v7, %v488_v9  ;;  %v397_v12 = vpop.f32.mrb[2].mxu0  ;;  %v490_v13 = vpop.f32.mrb[2].mxu1 }
 0x104   :  { %v399_v15 = vpop.f32.mrb[3].mxu0  ;;  %v492_v16 = vpop.f32.mrb[3].mxu1 }
 0x105   :  { %v569_v17 = vmax.f32 %v545_v10, %v557_v11  ;;  %v546_v18 = vmax.f32 %v397_v12, %v399_v15  ;;  %v558_v19 = vmax.f32 %v490_v13, %v492_v16  ;;  %v2320_v12 = vld [vmem:[%s3129_s3 + $0x120] ss:$8 sps:$4 sm:$0xff]  }
 0x107   :  { %v588_v20 = vadd.f32 %v2851_v14, %v569_v17  ;;  %v570_v21 = vmax.f32 %v546_v18, %v558_v19  ;;  %v2328_v18 = vld [vmem:[%s3129_s3 + $0x134] ss:$8 sps:$4 sm:$0xff]  }
 0x109   :  { %v589_v22 = vadd.f32 %v2851_v14, %v570_v21  ;;  %v403_v23 = vpop.f32.mrb[4].mxu0  ;;  %v496_v24 = vpop.f32.mrb[4].mxu1  ;;  %v600_v27 = vmax.f32 %v588_v20, 0.0 }
 0x10a   :  { %v405_v25 = vpop.f32.mrb[5].mxu0  ;;  %v498_v26 = vpop.f32.mrb[5].mxu1 }
 0x10b   :  { %v601_v28 = vmax.f32 %v589_v22, 0.0  ;;  %v547_v29 = vmax.f32 %v403_v23, %v405_v25  ;;  %v559_v30 = vmax.f32 %v496_v24, %v498_v26  ;;  %v407_v31 = vpop.f32.mrb[6].mxu0  ;;  %v500_v32 = vpop.f32.mrb[6].mxu1  ;;  %v2326_v25 = vld [vmem:[%s3129_s3 + $0x130] ss:$8 sps:$4 sm:$0xff]  }
 0x10c   :  { %v409_v33 = vpop.f32.mrb[7].mxu0  ;;  %v502_v34 = vpop.f32.mrb[7].mxu1  ;;  %v2334_v26 = vld [vmem:[%s3129_s3 + $0x144] ss:$8 sps:$4 sm:$0xff]  }
 0x10d   :  { %v612_v35 = vpack.c.bf16 %v601_v28, %v600_v27  ;;  %v571_v36 = vmax.f32 %v547_v29, %v559_v30  ;;  %v548_v37 = vmax.f32 %v407_v31, %v409_v33  ;;  %v560_v38 = vmax.f32 %v500_v32, %v502_v34 }
 0x10f   :  { %v590_v39 = vadd.f32 %v2851_v14, %v571_v36  ;;  %v572_v40 = vmax.f32 %v548_v37, %v560_v38  ;;  %v2332_v37 = vld [vmem:[%s3129_s3 + $0x140] ss:$8 sps:$4 sm:$0xff]  }
 0x111   :  { %v602_v41 = vmax.f32 %v590_v39, 0.0  ;;  %v591_v42 = vadd.f32 %v2851_v14, %v572_v40  ;;  %v413_v43 = vpop.f32.mrb[8].mxu0  ;;  %v506_v44 = vpop.f32.mrb[8].mxu1  ;;  %v2340_v40 = vld [vmem:[%s3129_s3 + $0x154] ss:$8 sps:$4 sm:$0xff]  }
 0x112   :  { %v415_v45 = vpop.f32.mrb[9].mxu0  ;;  %v508_v46 = vpop.f32.mrb[9].mxu1 }
 0x113   :  { %v603_v47 = vmax.f32 %v591_v42, 0.0  ;;  %v549_v48 = vmax.f32 %v413_v43, %v415_v45  ;;  %v561_v49 = vmax.f32 %v506_v44, %v508_v46  ;;  %v613_v50 = vpack.c.bf16 %v602_v41, %v601_v28  ;;  %v417_v52 = vpop.f32.mrb[10].mxu0  ;;  %v510_v53 = vpop.f32.mrb[10].mxu1 }
 0x114   :  { %v419_v54 = vpop.f32.mrb[11].mxu0  ;;  %v512_v55 = vpop.f32.mrb[11].mxu1 }
 0x115   :  { %v573_v57 = vmax.f32 %v549_v48, %v561_v49  ;;  %1135 = vmatprep.mubr.bf16.mxu0 %v613_v50  ;;  %v550_v58 = vmax.f32 %v417_v52, %v419_v54  ;;  %v562_v59 = vmax.f32 %v510_v53, %v512_v55  ;;  %v2863_v60 = vpack.c.bf16 %v603_v47, %v602_v41  ;;  %v2338_v48 = vld [vmem:[%s3129_s3 + $0x150] ss:$8 sps:$4 sm:$0xff]   ;;  %v2346_v50 = vld [vmem:[%s3129_s3 + $0x164] ss:$8 sps:$4 sm:$0xff]  }
 0x116   :  { %1136 = vmatmul.mubr.bf16.vlgmr.msra.gmra.mrb[24].mxu0 %v612_v35 }
 0x117   :  { %v592_v61 = vadd.f32 %v2851_v14, %v573_v57  ;;  %1177 = vmatpush1.bf16.msra.mxu0 %v2308_v51  ;;  %v574_v62 = vmax.f32 %v550_v58, %v562_v59  ;;  %v2344_v58 = vld [vmem:[%s3129_s3 + $0x160] ss:$8 sps:$4 sm:$0xff]  }
 0x118   :  { %1178 = vmatprep.subr.bf16.mxu0 %v2316_v56 }
 0x119   :  { %v604_v1 = vmax.f32 %v592_v61, 0.0  ;;  %v593_v2 = vadd.f32 %v2851_v14, %v574_v62  ;;  %v423_v3 = vpop.f32.mrb[12].mxu0  ;;  %v516_v4 = vpop.f32.mrb[12].mxu1 }
 0x11a   :  { %v425_v6 = vpop.f32.mrb[13].mxu0  ;;  %v518_v7 = vpop.f32.mrb[13].mxu1 }
 0x11b   :  { %v605_v8 = vmax.f32 %v593_v2, 0.0  ;;  %v551_v9 = vmax.f32 %v423_v3, %v425_v6  ;;  %v563_v10 = vmax.f32 %v516_v4, %v518_v7  ;;  %1179 = vmatpush1.bf16.msra.mxu0 %v2314_v63  ;;  %v2873_v11 = vpack.c.bf16 %v604_v1, %v603_v47  ;;  %v427_v13 = vpop.f32.mrb[14].mxu0  ;;  %v520_v15 = vpop.f32.mrb[14].mxu1 }
 0x11c   :  { %1180 = vmatprep.subr.bf16.mxu0 %v2322_v0  ;;  %v429_v16 = vpop.f32.mrb[15].mxu0  ;;  %v522_v17 = vpop.f32.mrb[15].mxu1 }
 0x11d   :  { %v575_v19 = vmax.f32 %v551_v9, %v563_v10  ;;  %1145 = vmatprep.mubr.bf16.mxu0 %v2873_v11  ;;  %v552_v20 = vmax.f32 %v427_v13, %v429_v16  ;;  %v564_v21 = vmax.f32 %v520_v15, %v522_v17  ;;  %v2882_v22 = vpack.c.bf16 %v605_v8, %v604_v1  ;;  %v2352_v1 = vld [vmem:[%s3129_s3 + $0x174] ss:$8 sps:$4 sm:$0xff]   ;;  %v2350_v9 = vld [vmem:[%s3129_s3 + $0x170] ss:$8 sps:$4 sm:$0xff]   ;;  %v2358_v13 = vld [vmem:[%s3129_s3 + $0x184] ss:$8 sps:$4 sm:$0xff]  }
 0x11e   :  { %1146 = vmatmul.mubr.bf16.gmra.mrb[28].mxu0 %v2863_v60 }
 0x11f   :  { %v594_v23 = vadd.f32 %v2851_v14, %v575_v19  ;;  %1181 = vmatpush1.bf16.msra.mxu0 %v2320_v12  ;;  %v576_v24 = vmax.f32 %v552_v20, %v564_v21  ;;  %1282 = vmatmul.mubr.bf16.vlgmr.msra.gmra.mrb[24].mxu1 %v2882_v22  ;;  %v2361_v19 = vld [vmem:[%s3129_s3 + $0x194] ss:$8 sps:$4 sm:$0xff]   ;;  %v2362_v21 = vld [vmem:[%s3129_s3 + $0x1a0] ss:$8 sps:$4 sm:$0xff]  }
 0x120   :  { %1182 = vmatprep.subr.bf16.mxu0 %v2328_v18  ;;  %1291 = vmatprep.mubr.bf16.mxu1 %v2427_v5 }
 0x121   :  { %v606_v27 = vmax.f32 %v594_v23, 0.0  ;;  %v595_v28 = vadd.f32 %v2851_v14, %v576_v24  ;;  %v433_v29 = vpop.f32.mrb[16].mxu0  ;;  %v526_v30 = vpop.f32.mrb[16].mxu1  ;;  %v2367_v23 = vld [vmem:[%s3129_s3 + $0x1b4] ss:$8 sps:$4 sm:$0xff]  }
 0x122   :  { %v435_v31 = vpop.f32.mrb[17].mxu0  ;;  %v528_v32 = vpop.f32.mrb[17].mxu1  ;;  %v2365_v24 = vld [vmem:[%s3129_s3 + $0x1b0] ss:$8 sps:$4 sm:$0xff]  }
 0x123   :  { %v607_v33 = vmax.f32 %v595_v28, 0.0  ;;  %v553_v34 = vmax.f32 %v433_v29, %v435_v31  ;;  %v565_v35 = vmax.f32 %v526_v30, %v528_v32  ;;  %1183 = vmatpush1.bf16.msra.mxu0 %v2326_v25  ;;  %v2895_v36 = vpack.c.bf16 %v606_v27, %v605_v8  ;;  %v437_v38 = vpop.f32.mrb[18].mxu0  ;;  %v530_v39 = vpop.f32.mrb[18].mxu1  ;;  %v2370_v25 = vld [vmem:[%s3129_s3 + $0x1c4] ss:$8 sps:$4 sm:$0xff]  }
 0x124   :  { %1184 = vmatprep.subr.bf16.mxu0 %v2334_v26  ;;  %v439_v41 = vpop.f32.mrb[19].mxu0  ;;  %v532_v42 = vpop.f32.mrb[19].mxu1  ;;  %v2368_v26 = vld [vmem:[%s3129_s3 + $0x1c0] ss:$8 sps:$4 sm:$0xff]   ;;  %v2371_v28 = vld [vmem:[%s3129_s3 + $0x1d0] ss:$8 sps:$4 sm:$0xff]  }
 0x125   :  { %v577_v43 = vmax.f32 %v553_v34, %v565_v35  ;;  %1155 = vmatprep.mubr.bf16.mxu0 %v2895_v36  ;;  %v2904_v44 = vpack.c.bf16 %v607_v33, %v606_v27  ;;  %v554_v45 = vmax.f32 %v437_v38, %v439_v41  ;;  %v566_v46 = vmax.f32 %v530_v39, %v532_v42  ;;  %v2373_v27 = vld [vmem:[%s3129_s3 + $0x1d4] ss:$8 sps:$4 sm:$0xff]   ;;  %v2376_v29 = vld [vmem:[%s3129_s3 + $0x1e4] ss:$8 sps:$4 sm:$0xff]   ;;  %v2374_v30 = vld [vmem:[%s3129_s3 + $0x1e0] ss:$8 sps:$4 sm:$0xff]  }
 0x126   :  { %1156 = vmatmul.mubr.bf16.gmra.mrb[32].mxu0 %v2882_v22  ;;  %v2379_v31 = vld [vmem:[%s3129_s3 + $0x1f4] ss:$8 sps:$4 sm:$0xff]   ;;  %v2377_v32 = vld [vmem:[%s3129_s3 + $0x1f0] ss:$8 sps:$4 sm:$0xff]   ;;  %v2381_v34 = vld [vmem:[%s3131_s5] sm:$0xff]  }
 0x127   :  { %v596_v47 = vadd.f32 %v2851_v14, %v577_v43  ;;  %1185 = vmatpush1.bf16.msra.mxu0 %v2332_v37  ;;  %v578_v49 = vmax.f32 %v554_v45, %v566_v46  ;;  %1292 = vmatmul.mubr.bf16.gmra.mrb[28].mxu1 %v2904_v44  ;;  %v2384_v35 = vld [vmem:[%s3131_s5 + $0x50] sm:$0xff]   ;;  %v2386_v37 = vld [vmem:[%s3131_s5 + $0x58] sm:$0xff]   ;;  %v2388_v39 = vld [vmem:[%s3131_s5 + $0x60] sm:$0xff]  }
 0x128   :  { %1186 = vmatprep.subr.bf16.mxu0 %v2340_v40  ;;  %1301 = vmatprep.mubr.bf16.mxu1 %v2427_v5  ;;  %v2387_v38 = vld [vmem:[%s3131_s5 + $0x18] sm:$0xff]   ;;  %v2389_v40 = vld [vmem:[%s3131_s5 + $0x20] sm:$0xff]   ;;  %v2390_v41 = vld [vmem:[%s3131_s5 + $0x68] sm:$0xff]  }
 0x129   :  { %v608_v51 = vmax.f32 %v596_v47, 0.0  ;;  %v597_v52 = vadd.f32 %v2851_v14, %v578_v49  ;;  %v443_v53 = vpop.f32.mrb[20].mxu0  ;;  %v536_v54 = vpop.f32.mrb[20].mxu1  ;;  %v2391_v42 = vld [vmem:[%s3131_s5 + $0x28] sm:$0xff]   ;;  %v2392_v43 = vld [vmem:[%s3131_s5 + $0x70] sm:$0xff]   ;;  %v2394_v45 = vld [vmem:[%s3131_s5 + $0x78] sm:$0xff]  }
 0x12a   :  { %v445_v55 = vpop.f32.mrb[21].mxu0  ;;  %v538_v56 = vpop.f32.mrb[21].mxu1  ;;  %v2395_v46 = vld [vmem:[%s3131_s5 + $0x38] sm:$0xff]   ;;  %v2396_v47 = vld [vmem:[%s3131_s5 + $0xc0] sm:$0xff]  }
 0x12b   :  { %1187 = vmatpush1.bf16.msra.mxu0 %v2338_v48  ;;  %v2917_v57 = vpack.c.bf16 %v608_v51, %v607_v33  ;;  %v609_v59 = vmax.f32 %v597_v52, 0.0  ;;  %v555_v61 = vmax.f32 %v443_v53, %v445_v55  ;;  %v567_v62 = vmax.f32 %v536_v54, %v538_v56  ;;  %v447_v63 = vpop.f32.mrb[22].mxu0  ;;  %v540_v0 = vpop.f32.mrb[22].mxu1  ;;  %v2380_v33 = vld [vmem:[%s3131_s5 + $0x40] sm:$0xff]  }
 0x12c   :  { %1188 = vmatprep.subr.bf16.mxu0 %v2346_v50  ;;  %v449_v2 = vpop.f32.mrb[23].mxu0  ;;  %v542_v3 = vpop.f32.mrb[23].mxu1  ;;  %2080 = vmatprep.subr.bf16.mxu1 %v2380_v33 }
 0x12d   :  { %1165 = vmatprep.mubr.bf16.mxu0 %v2917_v57  ;;  %v579_v4 = vmax.f32 %v555_v61, %v567_v62  ;;  %v620_v6 = vpack.c.bf16 %v609_v59, %v608_v51  ;;  %v556_v7 = vmax.f32 %v447_v63, %v449_v2  ;;  %v568_v8 = vmax.f32 %v540_v0, %v542_v3 }
 0x12e   :  { %1166 = vmatmul.mubr.bf16.gmra.mrb[36].mxu0 %v2904_v44  ;;  %2081 = vmatpush3.bf16.msra.mxu1 %v2381_v34 }
 0x12f   :  { %1189 = vmatpush1.bf16.msra.mxu0 %v2344_v58  ;;  %1208 = vmatprep.mubr.bf16.mxu0 %v2873_v11  ;;  %v598_v10 = vadd.f32 %v2851_v14, %v579_v4  ;;  %v580_v12 = vmax.f32 %v556_v7, %v568_v8  ;;  %v2356_v11 = vld [vmem:[%s3129_s3 + $0x180] ss:$8 sps:$4 sm:$0xff]  }
 0x130   :  { %1190 = vmatprep.subr.bf16.mxu0 %v2352_v1  ;;  %1302 = vmatmul.mubr.bf16.gmra.mrb[32].mxu1 %v620_v6 }
 0x131   :  { %v610_v15 = vmax.f32 %v598_v10, 0.0  ;;  %v599_v16 = vadd.f32 %v2851_v14, %v580_v12  ;;  %1311 = vmatprep.mubr.bf16.mxu1 %v2427_v5  ;;  %v2359_v14 = vld [vmem:[%s3129_s3 + $0x190] ss:$8 sps:$4 sm:$0xff]   ;;  %v2364_v5 = vld [vmem:[%s3129_s3 + $0x1a4] ss:$8 sps:$4 sm:$0xff]  }
 0x132   :  { %v2033_v12 = vld [vmem:[%s3132_s4] ss:$0 sm:$0xff] }
 0x133   :  { %1191 = vmatpush1.bf16.msra.mxu0 %v2350_v9  ;;  %v611_v17 = vmax.f32 %v599_v16, 0.0  ;;  %v621_v18 = vpack.c.bf16 %v610_v15, %v609_v59 }
 0x134   :  { %1192 = vmatprep.subr.bf16.mxu0 %v2358_v13 }
 0x135   :  { %v622_v20 = vpack.c.bf16 %v611_v17, %v610_v15 }
 0x137   :  { %1193 = vmatpush1.bf16.msra.mxu0 %v2356_v11 }
 0x138   :  { %1194 = vmatprep.subr.bf16.mxu0 %v2361_v19  ;;  %1312 = vmatmul.mubr.bf16.gmra.mrb[36].mxu1 %v622_v20 }
 0x13b   :  { %1195 = vmatpush1.bf16.msra.mxu0 %v2359_v14 }
 0x13c   :  { %1196 = vmatprep.subr.bf16.mxu0 %v2364_v5 }
 0x13f   :  { %1197 = vmatpush1.bf16.msra.mxu0 %v2362_v21 }
 0x140   :  { %1198 = vmatprep.subr.bf16.mxu0 %v2367_v23 }
 0x143   :  { %1199 = vmatpush1.bf16.msra.mxu0 %v2365_v24 }
 0x144   :  { %1200 = vmatprep.subr.bf16.mxu0 %v2370_v25 }
 0x147   :  { %1201 = vmatpush1.bf16.msra.mxu0 %v2368_v26 }
 0x148   :  { %1202 = vmatprep.subr.bf16.mxu0 %v2373_v27 }
 0x14b   :  { %1203 = vmatpush1.bf16.msra.mxu0 %v2371_v28 }
 0x14c   :  { %1204 = vmatprep.subr.bf16.mxu0 %v2376_v29 }
 0x14f   :  { %1205 = vmatpush1.bf16.msra.mxu0 %v2374_v30 }
 0x150   :  { %1206 = vmatprep.subr.bf16.mxu0 %v2379_v31 }
 0x153   :  { %1207 = vmatpush1.bf16.msra.mxu0 %v2377_v32 }
 0x156   :  { %1209 = vmatmul.mubr.bf16.vlgmr.msra.gmra.mrb[24].mxu0 %v2863_v60  ;;  %v2382_v60 = vld [vmem:[%s3131_s5 + $0x48] sm:$0xff]  }
 0x157   :  { %1218 = vmatprep.mubr.bf16.mxu0 %v2895_v36  ;;  %2082 = vmatprep.subr.bf16.mxu1 %v2382_v60  ;;  %v2385_v36 = vld [vmem:[%s3131_s5 + $0x10] sm:$0xff]  }
 0x15e   :  { %1219 = vmatmul.mubr.bf16.gmra.mrb[28].mxu0 %v2882_v22  ;;  %v2383_v22 = vld [vmem:[%s3131_s5 + $0x8] sm:$0xff]  }
 0x15f   :  { %1228 = vmatprep.mubr.bf16.mxu0 %v2917_v57  ;;  %2083 = vmatpush3.bf16.msra.mxu1 %v2383_v22 }
 0x160   :  { %2084 = vmatprep.subr.bf16.mxu1 %v2384_v35 }
 0x163   :  { %2085 = vmatpush3.bf16.msra.mxu1 %v2385_v36 }
 0x164   :  { %2086 = vmatprep.subr.bf16.mxu1 %v2386_v37 }
 0x166   :  { %1229 = vmatmul.mubr.bf16.gmra.mrb[32].mxu0 %v2904_v44  ;;  %v2393_v44 = vld [vmem:[%s3131_s5 + $0x30] sm:$0xff]  }
 0x167   :  { %1238 = vmatprep.mubr.bf16.mxu0 %v621_v18  ;;  %2087 = vmatpush3.bf16.msra.mxu1 %v2387_v38 }
 0x168   :  { %2088 = vmatprep.subr.bf16.mxu1 %v2388_v39 }
 0x16b   :  { %2089 = vmatpush3.bf16.msra.mxu1 %v2389_v40  ;;  %v2397_v40 = vld [vmem:[%s3131_s5 + $0x80] sm:$0xff]  }
 0x16c   :  { %2090 = vmatprep.subr.bf16.mxu1 %v2390_v41 }
 0x16e   :  { %1239 = vmatmul.mubr.bf16.gmra.mrb[36].mxu0 %v620_v6 }
 0x16f   :  { %2091 = vmatpush3.bf16.msra.mxu1 %v2391_v42  ;;  %v2398_v42 = vld [vmem:[%s3131_s5 + $0xc8] sm:$0xff]  }
 0x170   :  { %2092 = vmatprep.subr.bf16.mxu1 %v2392_v43 }
 0x173   :  { %2093 = vmatpush3.bf16.msra.mxu1 %v2393_v44 }
 0x174   :  { %2094 = vmatprep.subr.bf16.mxu1 %v2394_v45 }
 0x177   :  { %2095 = vmatpush3.bf16.msra.mxu1 %v2395_v46 }
 0x178   :  { %2102 = vmatprep.subr.bf16.mxu1 %v2396_v47 }
 0x1f2   :  { %v1283_v48 = vpop.f32.mrb[24].mxu1 }
 0x1f3   :  { %v1285_v49 = vpop.f32.mrb[25].mxu1 }
 0x1f4   :  { %v1287_v50 = vpop.f32.mrb[26].mxu1 }
 0x1f5   :  { %v1289_v51 = vpop.f32.mrb[27].mxu1 }
 0x1fa   :  { %v1293_v52 = vpop.f32.mrb[28].mxu1 }
 0x1fb   :  { %v1295_v53 = vpop.f32.mrb[29].mxu1 }
 0x1fc   :  { %v1297_v54 = vpop.f32.mrb[30].mxu1 }
 0x1fd   :  { %v1299_v55 = vpop.f32.mrb[31].mxu1 }
 0x203   :  { %v1303_v56 = vpop.f32.mrb[32].mxu1 }
 0x204   :  { %v1305_v57 = vpop.f32.mrb[33].mxu1 }
 0x205   :  { %v1307_v58 = vpop.f32.mrb[34].mxu1 }
 0x206   :  { %v1309_v59 = vpop.f32.mrb[35].mxu1 }
 0x20b   :  { %v1313_v61 = vpop.f32.mrb[36].mxu1 }
 0x20c   :  { %v1315_v62 = vpop.f32.mrb[37].mxu1 }
 0x20d   :  { %v1317_v63 = vpop.f32.mrb[38].mxu1 }
 0x20e   :  { %v1319_v0 = vpop.f32.mrb[39].mxu1 }
 0x229   :  { %v1210_v1 = vpop.f32.mrb[24].mxu0 }
 0x22a   :  { %v2161_v2 = vadd.f32 %v1283_v48, %v1210_v1  ;;  %v1212_v3 = vpop.f32.mrb[25].mxu0 }
 0x22b   :  { %v2162_v4 = vadd.f32 %v1285_v49, %v1212_v3  ;;  %v1214_v6 = vpop.f32.mrb[26].mxu0 }
 0x22c   :  { %v2163_v7 = vadd.f32 %v1287_v50, %v1214_v6  ;;  %v1216_v8 = vpop.f32.mrb[27].mxu0  ;;  %v2406_v6 = vld [vmem:[%s3131_s5 + $0xe8] sm:$0xff]  }
 0x22d   :  { %v1322_v9 = vmax.f32 %v2161_v2, %v2162_v4  ;;  %v2164_v10 = vadd.f32 %v1289_v51, %v1216_v8  ;;  %v2399_v51 = vld [vmem:[%s3131_s5 + $0x88] sm:$0xff]   ;;  %v2405_v4 = vld [vmem:[%s3131_s5 + $0xa0] sm:$0xff]   ;;  %v2408_v8 = vld [vmem:[%s3131_s5 + $0xf0] sm:$0xff]  }
 0x22f   :  { %v1323_v13 = vmax.f32 %v2163_v7, %v2164_v10  ;;  %v1337_v15 = vadd.f32 %v2033_v12, %v1322_v9  ;;  %v2407_v7 = vld [vmem:[%s3131_s5 + $0xa8] sm:$0xff]   ;;  %v2409_v9 = vld [vmem:[%s3131_s5 + $0xb0] sm:$0xff]   ;;  %v2410_v10 = vld [vmem:[%s3131_s5 + $0xf8] sm:$0xff]  }
 0x231   :  { %v1338_v16 = vadd.f32 %v2033_v12, %v1323_v13  ;;  %v1220_v11 = vpop.f32.mrb[28].mxu0 }
 0x232   :  { %v2165_v17 = vadd.f32 %v1293_v52, %v1220_v11  ;;  %v1222_v18 = vpop.f32.mrb[29].mxu0  ;;  %v2412_v11 = vld [vmem:[%s3133_s7] sm:$0xff]  }
 0x233   :  { %v1345_v19 = vmax.f32 %v1337_v15, %v1338_v16  ;;  %v2166_v20 = vadd.f32 %v1295_v53, %v1222_v18  ;;  %v1224_v14 = vpop.f32.mrb[30].mxu0  ;;  %v2428_v16 = vmov 0.0   ;;  %v2414_v18 = vld [vmem:[%s3133_s7 + $0x10] sm:$0xff]  }
 0x234   :  { %v2167_v5 = vadd.f32 %v1297_v54, %v1224_v14  ;;  %v1226_v21 = vpop.f32.mrb[31].mxu0  ;;  %v2400_v54 = vld [vmem:[%s3131_s5 + $0xd0] sm:$0xff]   ;;  %v2417_v14 = vld [vmem:[%s3133_s7 + $0x28] sm:$0xff]  }
 0x235   :  { %v1324_v23 = vmax.f32 %v2165_v17, %v2166_v20  ;;  %v2168_v24 = vadd.f32 %v1299_v55, %v1226_v21  ;;  %v1349_v34 = vmax.f32 %v1345_v19, 0.0  ;;  %v2413_v17 = vld [vmem:[%s3133_s7 + $0x8] sm:$0xff]   ;;  %v2415_v19 = vld [vmem:[%s3133_s7 + $0x18] sm:$0xff]   ;;  %v2416_v20 = vld [vmem:[%s3133_s7 + $0x20] sm:$0xff]  }
 0x237   :  { %v1325_v25 = vmax.f32 %v2167_v5, %v2168_v24  ;;  %v1339_v26 = vadd.f32 %v2033_v12, %v1324_v23  ;;  %v1353_v41 = vpack.c.bf16 %v1349_v34, %v1349_v34  ;;  %v2418_v5 = vld [vmem:[%s3133_s7 + $0x30] ss:$0 sps:$4 sm:$0x33]  }
 0x238   :  { %v1767_v21 = vsel %vm1765_vm2, %v2418_v5, 0 }
 0x239   :  { %v1340_v27 = vadd.f32 %v2033_v12, %v1325_v25  ;;  %v1230_v28 = vpop.f32.mrb[32].mxu0 }
 0x23a   :  { %v2169_v29 = vadd.f32 %v1303_v56, %v1230_v28  ;;  %v1232_v30 = vpop.f32.mrb[33].mxu0  ;;  %v2034_v28 = vld [vmem:[%s3134_s6] ss:$0 sm:$0xff] }
 0x23b   :  { %v2170_v31 = vadd.f32 %v1305_v57, %v1232_v30  ;;  %v1234_v32 = vpop.f32.mrb[34].mxu0  ;;  %v1346_v33 = vmax.f32 %v1339_v26, %v1340_v27 }
 0x23c   :  { %v2171_v60 = vadd.f32 %v1307_v58, %v1234_v32  ;;  %v1236_v22 = vpop.f32.mrb[35].mxu0  ;;  %v2401_v58 = vld [vmem:[%s3131_s5 + $0x90] sm:$0xff]  }
 0x23d   :  { %v1326_v35 = vmax.f32 %v2169_v29, %v2170_v31  ;;  %v2172_v36 = vadd.f32 %v1309_v59, %v1236_v22  ;;  %v1350_v37 = vmax.f32 %v1346_v33, 0.0  ;;  %v2402_v59 = vld [vmem:[%s3131_s5 + $0xd8] sm:$0xff]  }
 0x23f   :  { %v1327_v38 = vmax.f32 %v2171_v60, %v2172_v36  ;;  %v1354_v39 = vpack.c.bf16 %v1350_v37, %v1350_v37  ;;  %v1341_v43 = vadd.f32 %v2033_v12, %v1326_v35  ;;  %v2419_v36 = vld [vmem:[%s3135_s9] sm:$0xff]   ;;  %v2420_v37 = vld [vmem:[%s3135_s9 + $0x8] sm:$0xff]  }
 0x241   :  { %v1342_v44 = vadd.f32 %v2033_v12, %v1327_v38  ;;  %v1240_v45 = vpop.f32.mrb[36].mxu0  ;;  %1652 = vmatprep.mubr.bf16.mxu1 %v1354_v39  ;;  %v2067_v38 = vld [vmem:[%s3136_s8] ss:$0 sm:$0xff] }
 0x242   :  { %v2173_v46 = vadd.f32 %v1313_v61, %v1240_v45  ;;  %v1242_v47 = vpop.f32.mrb[37].mxu0  ;;  %1653 = vmatmul.mubr.bf16.vlgmr.msra.gmra.mrb[40].mxu1 %v1353_v41 }
 0x243   :  { %v1347_v48 = vmax.f32 %v1341_v43, %v1342_v44  ;;  %v2174_v49 = vadd.f32 %v1315_v62, %v1242_v47  ;;  %2103 = vmatpush3.bf16.msra.mxu1 %v2397_v40  ;;  %v1244_v50 = vpop.f32.mrb[38].mxu0 }
 0x244   :  { %v2175_v52 = vadd.f32 %v1317_v63, %v1244_v50  ;;  %v1246_v53 = vpop.f32.mrb[39].mxu0  ;;  %2104 = vmatprep.subr.bf16.mxu1 %v2398_v42  ;;  %v2403_v63 = vld [vmem:[%s3131_s5 + $0x98] sm:$0xff]  }
 0x245   :  { %v1328_v55 = vmax.f32 %v2173_v46, %v2174_v49  ;;  %v2176_v56 = vadd.f32 %v1319_v0, %v1246_v53  ;;  %v2404_v0 = vld [vmem:[%s3131_s5 + $0xe0] sm:$0xff]   ;;  %v1351_v13 = vmax.f32 %v1347_v48, 0.0 }
 0x246   :  { %v2076_v46 = vld [vmem:[%s3137_s10] ss:$0 sm:$0xff] }
 0x247   :  { %v1329_v57 = vmax.f32 %v2175_v52, %v2176_v56  ;;  %2105 = vmatpush3.bf16.msra.mxu1 %v2399_v51  ;;  %v1343_v61 = vadd.f32 %v2033_v12, %v1328_v55  ;;  %v1355_v15 = vpack.c.bf16 %v1351_v13, %v1351_v13 }
 0x248   :  { %2106 = vmatprep.subr.bf16.mxu1 %v2400_v54 }
 0x249   :  { %v1344_v62 = vadd.f32 %v2033_v12, %v1329_v57  ;;  %v2411_v12 = vld [vmem:[%s3131_s5 + $0xb8] sm:$0xff]  }
 0x24b   :  { %2107 = vmatpush3.bf16.msra.mxu1 %v2401_v58  ;;  %v1348_v1 = vmax.f32 %v1343_v61, %v1344_v62 }
 0x24c   :  { %2108 = vmatprep.subr.bf16.mxu1 %v2402_v59 }
 0x24d   :  { %v1352_v2 = vmax.f32 %v1348_v1, 0.0 }
 0x24f   :  { %2109 = vmatpush3.bf16.msra.mxu1 %v2403_v63  ;;  %v1356_v3 = vpack.c.bf16 %v1352_v2, %v1352_v2 }
 0x250   :  { %2110 = vmatprep.subr.bf16.mxu1 %v2404_v0 }
 0x251   :  { %1692 = vmatprep.mubr.bf16.mxu1 %v1356_v3 }
 0x253   :  { %2111 = vmatpush3.bf16.msra.mxu1 %v2405_v4 }
 0x254   :  { %2112 = vmatprep.subr.bf16.mxu1 %v2406_v6 }
 0x257   :  { %2113 = vmatpush3.bf16.msra.mxu1 %v2407_v7 }
 0x258   :  { %2114 = vmatprep.subr.bf16.mxu1 %v2408_v8 }
 0x25b   :  { %2115 = vmatpush3.bf16.msra.mxu1 %v2409_v9 }
 0x25c   :  { %2116 = vmatprep.subr.bf16.mxu1 %v2410_v10 }
 0x25f   :  { %2117 = vmatpush3.bf16.msra.mxu1 %v2411_v12 }
 0x260   :  { %2135 = vmatprep.subr.bf16.mxu1 %v2428_v16 }
 0x262   :  { %1693 = vmatmul.mubr.bf16.vlgmr.msra.gmra.mrb[44].mxu1 %v1355_v15 }
 0x263   :  { %2136 = vmatpush3.bf16.msra.mxu1 %v2412_v11  ;;  %2149 = vmatprep.mubr.msk.bf16.mxu1 %vm2429_vm3, %v2428_v16 }
 0x264   :  { %2137 = vmatprep.subr.bf16.mxu1 %v2428_v16 }
 0x267   :  { %2138 = vmatpush3.bf16.msra.mxu1 %v2413_v17 }
 0x268   :  { %2139 = vmatprep.subr.bf16.mxu1 %v2428_v16 }
 0x26b   :  { %2140 = vmatpush3.bf16.msra.mxu1 %v2414_v18 }
 0x26c   :  { %2141 = vmatprep.subr.bf16.mxu1 %v2428_v16 }
 0x26f   :  { %2142 = vmatpush3.bf16.msra.mxu1 %v2415_v19 }
 0x270   :  { %2143 = vmatprep.subr.bf16.mxu1 %v2428_v16 }
 0x273   :  { %2144 = vmatpush3.bf16.msra.mxu1 %v2416_v20 }
 0x274   :  { %2145 = vmatprep.subr.bf16.mxu1 %v2428_v16 }
 0x277   :  { %2146 = vmatpush3.bf16.msra.mxu1 %v2417_v14 }
 0x278   :  { %2147 = vmatprep.subr.bf16.mxu1 %v2428_v16 }
 0x27b   :  { %2148 = vmatpush3.bf16.msra.mxu1 %v1767_v21 }
 0x27c   :  { %2153 = vmatprep.subr.bf16.mxu1 %v2428_v16 }
 0x315   :  { %v2096_v23 = vpop.f32.mrb[40].mxu1 }
 0x316   :  { %v2097_v24 = vpop.f32.mrb[41].mxu1 }
 0x317   :  { %v2098_v25 = vadd.f32 %v2097_v24, %v2096_v23  ;;  %v2099_v26 = vpop.f32.mrb[42].mxu1 }
 0x318   :  { %v2100_v27 = vpop.f32.mrb[43].mxu1 }
 0x319   :  { %v1655_v31 = vadd.f32 %v2098_v25, %v2034_v28 }
 0x335   :  { %v2118_v29 = vpop.f32.mrb[44].mxu1 }
 0x336   :  { %v2119_v30 = vpop.f32.mrb[45].mxu1 }
 0x337   :  { %v2120_v32 = vadd.f32 %v2119_v30, %v2118_v29  ;;  %v2121_v33 = vpop.f32.mrb[46].mxu1 }
 0x338   :  { %v2122_v34 = vpop.f32.mrb[47].mxu1 }
 0x339   :  { %v1695_v60 = vadd.f32 %v2120_v32, %v1655_v31 }
 0x33b   :  { %v1700_v22 = vmax.f32 %v1695_v60, 0.0 }
 0x33d   :  { %v1701_v35 = vpack.c.bf16 %v1700_v22, %v1700_v22 }
 0x33f   :  { %2150 = vmatmul.mubr.msk.bf16.vlgmr.msra.gmra.mrb[48].mxu1 %vm1761_vm4, %v1701_v35 }
 0x340   :  { %2157 = vmatprep.mubr.msk.bf16.mxu1 %vm2429_vm3, %v2428_v16  ;;  %2154 = vmatpush3.bf16.msra.mxu1 %v2419_v36 }
 0x341   :  { %2155 = vmatprep.subr.bf16.mxu1 %v2428_v16 }
 0x344   :  { %2156 = vmatpush3.bf16.msra.mxu1 %v2420_v37 }
 0x412   :  { %v1803_v39 = vpop.f32.mrb[48].mxu1 }
 0x413   :  { %v1804_v40 = vadd.f32 %v2067_v38, %v1803_v39  ;;  %v2151_v41 = vpop.f32.mrb[49].mxu1 }
 0x414   :  { %v1806_v42 = vpop.f32.mrb[50].mxu1 }
 0x415   :  { %2421 = vtanh.f32 %v1804_v40  ;;  %v2152_v43 = vpop.f32.mrb[51].mxu1 }
 0x41f   :  { %v2422_v44 = vpop.eup %2421 }
 0x420   :  { %v1810_v45 = vpack.c.bf16 %v2422_v44, %v2422_v44 }
 0x422   :  { %2158 = vmatmul.mubr.msk.bf16.vlgmr.msra.gmra.mrb[52].mxu1 %vm1834_vm5, %v1810_v45 }
 0x4f5   :  { %v1872_v47 = vpop.f32.mrb[52].mxu1 }
 0x4f6   :  { %v1873_v48 = vadd.f32 %v2076_v46, %v1872_v47  ;;  %v2159_v49 = vpop.f32.mrb[53].mxu1 }
 0x4f7   :  { %v1875_v50 = vpop.f32.mrb[54].mxu1 }
 0x4f8   :  { %1878 = vmax.xlane.f32.xlu0 %v1873_v48  ;;  %v2160_v51 = vpop.f32.mrb[55].mxu1 }
 0x585   :  { %v1879_v52 = vpop.xlane.xlu0 %1878 }
 0x586   :  { %v1880_v53 = vsub.f32 %v1873_v48, %v1879_v52 }
 0x588   :  { %v1881_v54 = vmul.f32 1.442695, %v1880_v53 }
 0x58a   :  { %2423 = vpow2.f32 %v1881_v54 }
 0x594   :  { %v2424_v55 = vpop.eup %2423 }
 0x595   :  { %1883 = vadd.xlane.f32.xlu0 %v2424_v55 }
 0x622   :  { %v1884_v56 = vpop.xlane.xlu0 %1883 }
 0x623   :  { %2425 = vlog2.f32 %v1884_v56 }
 0x62d   :  { %v2426_v57 = vpop.eup %2425 }
 0x62e   :  { %v1886_v58 = vmul.f32 0.6931472, %v2426_v57 }
 0x630   :  { %v1887_v59 = vadd.f32 %v1886_v58, %v1879_v52 }
 0x632   :  { %v1888_v61 = vsub.f32 %v1873_v48, %v1887_v59 }
 0x634   :  { %1889 = vst [vmem:[%s3138_s11] sm:$0xff] %v1888_v61 }

</bundles_post_ra>
